<compile_context>
chip_gen: v7x
topology: tpu7x:2x2x1
jax: 0.10.0
libtpu: 0.0.40
codegen_flags: <defaults>
</compile_context>

<pallas_src>
import jax
import jax.numpy as jnp
from jax.experimental import pallas as pl
from jax.experimental.pallas import tpu as pltpu

B = 256                      # batch (tiled by TILE_B)
L = 8                        # max bag length
D = 64                       # embedding_dim
V = 128                      # num_embeddings per table
LAYER_SIZES = [128, 128]     # MLP layer_sizes (multiples of 128 -> full MXU columns)
TILE_B = 128                 # batch tile: fills MXU rows on v5e (128) and most of v6e/v7x


def two_tower_kernel(ids_ref, lens_ref, tableT_ref,
                     w1T_ref, b1T_ref, w2T_ref, b2T_ref, outT_ref):
    """One (tower, batch-tile) per grid step: in-kernel EmbeddingBag(SUM) + 2-layer MLP.

    Everything is computed transposed (features on sublanes, batch on lanes) so all
    operands and the output slab are lane-dense.
    """
    ids = ids_ref[...]            # (1, TILE_B*L) int32, padded slots hold arbitrary ids
    lens = lens_ref[...]          # (1, TILE_B)   int32 per-sample bag lengths
    tableT = tableT_ref[...]      # (D, V)        bf16 embedding table (transposed)

    bl = ids.shape[1]
    tb = lens.shape[1]
    v = tableT.shape[1]
    l = bl // tb

    # One-hot lookup matrix, transposed: onehotT[v, j] = (ids[j] == v).
    # ids is a lane-dense row -> sublane stride-0 broadcast against the iota.
    vocab_iota = jax.lax.broadcasted_iota(jnp.int32, (v, bl), 0)
    onehotT = (ids == vocab_iota).astype(jnp.bfloat16)                       # (V, BL)

    # Jagged-length pooling mask, transposed:
    # poolT[j, b] = 1 iff flat token j belongs to sample b and its position < lens[b].
    j_iota = jax.lax.broadcasted_iota(jnp.int32, (bl, tb), 0)
    b_iota = jax.lax.broadcasted_iota(jnp.int32, (bl, tb), 1)
    start = b_iota * l
    poolT = ((j_iota >= start) & (j_iota < start + lens)).astype(jnp.bfloat16)  # (BL, TB)

    # EmbeddingBag SUM pooling as two bf16 MXU matmuls with f32 accumulation.
    # counts are exact small integers (<= L); padded ids are zeroed by poolT.
    countsT = jnp.dot(onehotT, poolT, preferred_element_type=jnp.float32)       # (V, TB)
    pooledT = jnp.dot(tableT, countsT.astype(jnp.bfloat16),
                      preferred_element_type=jnp.float32)                       # (D, TB)

    # torchrec MLP: Linear + ReLU on every layer (including the last), transposed.
    h = jnp.dot(w1T_ref[...], pooledT.astype(jnp.bfloat16),
                preferred_element_type=jnp.float32) + b1T_ref[...]              # (H1, TB)
    h = jnp.maximum(h, 0.0)
    h = jnp.dot(w2T_ref[...], h.astype(jnp.bfloat16),
                preferred_element_type=jnp.float32) + b2T_ref[...]              # (H2, TB)
    h = jnp.maximum(h, 0.0)
    outT_ref[...] = h.astype(outT_ref.dtype)                                    # lane-dense store


def two_tower_forward(ids, lens, tablesT, w1T, b1T, w2T, b2T, *, tile_b, max_len):
    """Fused two-tower forward.

    ids:     (2, 1, B*L)  int32  padded, flattened bag ids (tower, 1, tokens)
    lens:    (2, 1, B)    int32  per-sample bag lengths
    tablesT: (2, D, V)    bf16   embedding tables, transposed
    w1T:     (2, H1, D)   bf16 ; b1T: (2, H1, 1) f32
    w2T:     (2, H2, H1)  bf16 ; b2T: (2, H2, 1) f32
    Returns (query_embedding, candidate_embedding), each (B, H2) f32.
    """
    n_t = ids.shape[0]
    b_total = lens.shape[2]
    n_bt = b_total // tile_b
    assert n_bt * tile_b == b_total
    d, v = tablesT.shape[1], tablesT.shape[2]
    h1 = w1T.shape[1]
    h2 = w2T.shape[1]

    def pinned(*dims):
        # Weights / tables: resident across batch tiles (block 0 along batch axis).
        nd = len(dims)
        return pl.BlockSpec((pl.Squeezed(),) + dims, lambda t, bi: (t,) + (0,) * nd)

    outT = pl.pallas_call(
        two_tower_kernel,
        out_shape=jax.ShapeDtypeStruct((n_t, h2, b_total), jnp.float32),
        grid=(n_t, n_bt),                      # tower outermost -> one weight DMA wave per tower
        in_specs=[
            pl.BlockSpec((pl.Squeezed(), 1, tile_b * max_len), lambda t, bi: (t, 0, bi)),  # ids
            pl.BlockSpec((pl.Squeezed(), 1, tile_b), lambda t, bi: (t, 0, bi)),            # lens
            pinned(d, v),        # embedding table (transposed)
            pinned(h1, d),       # w1^T
            pinned(h1, 1),       # b1^T
            pinned(h2, h1),      # w2^T
            pinned(h2, 1),       # b2^T
        ],
        out_specs=pl.BlockSpec((pl.Squeezed(), h2, tile_b), lambda t, bi: (t, 0, bi)),
        compiler_params=pltpu.CompilerParams(
            # Both axes are independent -> safe for megacore sharding on v7x;
            # VMEM budget stated explicitly and sized well under v7x's 64 MiB.
            dimension_semantics=("parallel", "parallel"),
            vmem_limit_bytes=32 * 1024 * 1024,
        ),
    )(ids, lens, tablesT, w1T, b1T, w2T, b2T)

    out = jnp.transpose(outT, (0, 2, 1))       # (n_t, B, H2): tiny de-transpose in XLA
    return out[0], out[1]


def make_mlp_params(key, in_size, layer_sizes):
    """Deterministic Linear params: bf16 weights (D_in, D_out) + f32 bias (1, D_out)."""
    params = []
    d_in = in_size
    for d_out in layer_sizes:
        key, k_w, k_b = jax.random.split(key, 3)
        bound = 1.0 / jnp.sqrt(d_in)
        w = jax.random.uniform(k_w, (d_in, d_out), jnp.float32, -bound, bound)
        bias = jax.random.uniform(k_b, (1, d_out), jnp.float32, -bound, bound)
        params.append((w.astype(jnp.bfloat16), bias))
        d_in = d_out
    return params


if __name__ == "__main__":
    key = jax.random.PRNGKey(0)
    (k_tq, k_tc, k_qi, k_ql, k_ci, k_cl, k_qmlp, k_cmlp) = jax.random.split(key, 8)

    # EmbeddingBagCollection tables (synthetic, deterministic), stored bf16.
    emb_table_q = (jax.random.normal(k_tq, (V, D), jnp.float32) * 0.1).astype(jnp.bfloat16)
    emb_table_c = (jax.random.normal(k_tc, (V, D), jnp.float32) * 0.1).astype(jnp.bfloat16)

    # KJT-like jagged inputs: padded ids (B, L) + per-sample lengths.
    q_ids = jax.random.randint(k_qi, (B, L), 0, V)
    q_lens = jax.random.randint(k_ql, (B,), 1, L + 1)
    c_ids = jax.random.randint(k_ci, (B, L), 0, V)
    c_lens = jax.random.randint(k_cl, (B,), 1, L + 1)

    # Two independent MLP towers (query_proj / candidate_proj), in_size = embedding_dim.
    q_params = make_mlp_params(k_qmlp, D, LAYER_SIZES)
    c_params = make_mlp_params(k_cmlp, D, LAYER_SIZES)

    # Stack towers and pre-transpose to the lane-dense kernel layout (free, host-side).
    ids = jnp.stack([q_ids, c_ids]).reshape(2, 1, B * L).astype(jnp.int32)
    lens = jnp.stack([q_lens, c_lens]).reshape(2, 1, B).astype(jnp.int32)
    tablesT = jnp.stack([emb_table_q.T, emb_table_c.T])                       # (2, D, V) bf16
    w1T = jnp.stack([q_params[0][0].T, c_params[0][0].T])                     # (2, H1, D) bf16
    b1T = jnp.stack([q_params[0][1].T, c_params[0][1].T])                     # (2, H1, 1) f32
    w2T = jnp.stack([q_params[1][0].T, c_params[1][0].T])                     # (2, H2, H1) bf16
    b2T = jnp.stack([q_params[1][1].T, c_params[1][1].T])                     # (2, H2, 1) f32

    query_emb, cand_emb = two_tower_forward(ids, lens, tablesT, w1T, b1T, w2T, b2T,
                                            tile_b=TILE_B, max_len=L)
    jax.block_until_ready((query_emb, cand_emb))

    # Pure-JAX reference: gather + masked sum pooling + MLP (ReLU every layer),
    # mirroring the kernel's bf16 matmul operands with f32 accumulation.
    def ref_tower(table_bf16, ids_bl, lens_b, params):
        tok = table_bf16.astype(jnp.float32)[ids_bl]                          # (B, L, D)
        mask = (jnp.arange(L)[None, :] < lens_b[:, None]).astype(jnp.float32)[..., None]
        h = jnp.sum(tok * mask, axis=1)                                       # (B, D) f32
        for w_bf16, bias in params:
            h = jnp.dot(h.astype(jnp.bfloat16), w_bf16,
                        preferred_element_type=jnp.float32) + bias
            h = jnp.maximum(h, 0.0)
        return h

    ref_q = ref_tower(emb_table_q, q_ids, q_lens, q_params)
    ref_c = ref_tower(emb_table_c, c_ids, c_lens, c_params)
    assert query_emb.shape == (B, LAYER_SIZES[-1])
    assert cand_emb.shape == (B, LAYER_SIZES[-1])
    assert jnp.allclose(query_emb, ref_q, atol=2e-3, rtol=2e-3)
    assert jnp.allclose(cand_emb, ref_c, atol=2e-3, rtol=2e-3)

    print("KERNEL_OK")
</pallas_src>

<mosaic_0001>
module attributes {stable_mosaic.version = 11 : i64} {
  func.func @two_tower_kernel(%arg0: i32, %arg1: i32, %arg2: memref<1x1x1024xi32, #tpu.memory_space<vmem>>, %arg3: memref<1x1x128xi32, #tpu.memory_space<vmem>>, %arg4: memref<1x64x128xbf16, #tpu.memory_space<vmem>>, %arg5: memref<1x128x64xbf16, #tpu.memory_space<vmem>>, %arg6: memref<1x128x1xf32, #tpu.memory_space<vmem>>, %arg7: memref<1x128x128xbf16, #tpu.memory_space<vmem>>, %arg8: memref<1x128x1xf32, #tpu.memory_space<vmem>>, %arg9: memref<1x128x128xf32, #tpu.memory_space<vmem>>) attributes {dimension_semantics = [#tpu.dimension_semantics<parallel>, #tpu.dimension_semantics<parallel>], iteration_bounds = array<i64: 2, 2>, scalar_prefetch = 0 : i64, scratch_operands = 0 : i64, tpu.core_type = #tpu.core_type<tc>, window_params = [{transform_indices = @transform_0, window_bounds = array<i64: 1, 1, 1024>}, {transform_indices = @transform_1, window_bounds = array<i64: 1, 1, 128>}, {transform_indices = @transform_2, window_bounds = array<i64: 1, 64, 128>}, {transform_indices = @transform_3, window_bounds = array<i64: 1, 128, 64>}, {transform_indices = @transform_4, window_bounds = array<i64: 1, 128, 1>}, {transform_indices = @transform_5, window_bounds = array<i64: 1, 128, 128>}, {transform_indices = @transform_6, window_bounds = array<i64: 1, 128, 1>}, {transform_indices = @transform_7, window_bounds = array<i64: 1, 128, 128>}]} {
    %c0 = arith.constant 0 : index
    %c0_0 = arith.constant 0 : index
    %c0_1 = arith.constant 0 : index
    %0 = vector.load %arg2[%c0, %c0_0, %c0_1] : memref<1x1x1024xi32, #tpu.memory_space<vmem>>, vector<1x1x1024xi32>
    %1 = vector.shape_cast %0 : vector<1x1x1024xi32> to vector<1x1024xi32>
    %c0_2 = arith.constant 0 : index
    %c0_3 = arith.constant 0 : index
    %c0_4 = arith.constant 0 : index
    %2 = vector.load %arg3[%c0_2, %c0_3, %c0_4] : memref<1x1x128xi32, #tpu.memory_space<vmem>>, vector<1x1x128xi32>
    %3 = vector.shape_cast %2 : vector<1x1x128xi32> to vector<1x128xi32>
    %c0_5 = arith.constant 0 : index
    %c0_6 = arith.constant 0 : index
    %c0_7 = arith.constant 0 : index
    %4 = vector.load %arg4[%c0_5, %c0_6, %c0_7] : memref<1x64x128xbf16, #tpu.memory_space<vmem>>, vector<1x64x128xbf16>
    %5 = vector.shape_cast %4 : vector<1x64x128xbf16> to vector<64x128xbf16>
    %6 = tpu.iota {dimensions = array<i32: 0>} : vector<128x1024xi32>
    %7 = vector.broadcast %1 : vector<1x1024xi32> to vector<128x1024xi32>
    %8 = arith.cmpi eq, %7, %6 : vector<128x1024xi32>
    %9 = arith.extui %8 : vector<128x1024xi1> to vector<128x1024xi32>
    %10 = arith.sitofp %9 : vector<128x1024xi32> to vector<128x1024xf32>
    %11 = arith.truncf %10 : vector<128x1024xf32> to vector<128x1024xbf16>
    %12 = tpu.iota {dimensions = array<i32: 0>} : vector<1024x128xi32>
    %13 = tpu.iota {dimensions = array<i32: 1>} : vector<1024x128xi32>
    %c8_i32 = arith.constant 8 : i32
    %14 = vector.broadcast %c8_i32 : i32 to vector<1024x128xi32>
    %15 = arith.muli %13, %14 : vector<1024x128xi32>
    %16 = arith.cmpi sge, %12, %15 : vector<1024x128xi32>
    %17 = vector.broadcast %3 : vector<1x128xi32> to vector<1024x128xi32>
    %18 = arith.addi %15, %17 : vector<1024x128xi32>
    %19 = arith.cmpi slt, %12, %18 : vector<1024x128xi32>
    %20 = arith.andi %16, %19 : vector<1024x128xi1>
    %21 = arith.extui %20 : vector<1024x128xi1> to vector<1024x128xi32>
    %22 = arith.sitofp %21 : vector<1024x128xi32> to vector<1024x128xf32>
    %23 = arith.truncf %22 : vector<1024x128xf32> to vector<1024x128xbf16>
    %cst = arith.constant dense<0.000000e+00> : vector<128x128xf32>
    %24 = tpu.matmul %11, %23, %cst {dimension_numbers = #tpu.dot_dimension_numbers<[1], [0], [0], [1], [0, 0, 1, 1], [], []>} : vector<128x1024xbf16>, vector<1024x128xbf16>, vector<128x128xf32> -> vector<128x128xf32>
    %25 = arith.truncf %24 : vector<128x128xf32> to vector<128x128xbf16>
    %cst_8 = arith.constant dense<0.000000e+00> : vector<64x128xf32>
    %26 = tpu.matmul %5, %25, %cst_8 {dimension_numbers = #tpu.dot_dimension_numbers<[1], [0], [0], [1], [0, 0, 1, 1], [], []>} : vector<64x128xbf16>, vector<128x128xbf16>, vector<64x128xf32> -> vector<64x128xf32>
    %c0_9 = arith.constant 0 : index
    %c0_10 = arith.constant 0 : index
    %c0_11 = arith.constant 0 : index
    %27 = vector.load %arg5[%c0_9, %c0_10, %c0_11] : memref<1x128x64xbf16, #tpu.memory_space<vmem>>, vector<1x128x64xbf16>
    %28 = vector.shape_cast %27 : vector<1x128x64xbf16> to vector<128x64xbf16>
    %29 = arith.truncf %26 : vector<64x128xf32> to vector<64x128xbf16>
    %cst_12 = arith.constant dense<0.000000e+00> : vector<128x128xf32>
    %30 = tpu.matmul %28, %29, %cst_12 {dimension_numbers = #tpu.dot_dimension_numbers<[1], [0], [0], [1], [0, 0, 1, 1], [], []>} : vector<128x64xbf16>, vector<64x128xbf16>, vector<128x128xf32> -> vector<128x128xf32>
    %c0_13 = arith.constant 0 : index
    %c0_14 = arith.constant 0 : index
    %c0_15 = arith.constant 0 : index
    %31 = vector.load %arg6[%c0_13, %c0_14, %c0_15] : memref<1x128x1xf32, #tpu.memory_space<vmem>>, vector<1x128x1xf32>
    %32 = vector.shape_cast %31 : vector<1x128x1xf32> to vector<128x1xf32>
    %33 = vector.broadcast %32 : vector<128x1xf32> to vector<128x128xf32>
    %34 = arith.addf %30, %33 : vector<128x128xf32>
    %cst_16 = arith.constant 0.000000e+00 : f32
    %35 = vector.broadcast %cst_16 : f32 to vector<128x128xf32>
    %36 = arith.maximumf %34, %35 : vector<128x128xf32>
    %c0_17 = arith.constant 0 : index
    %c0_18 = arith.constant 0 : index
    %c0_19 = arith.constant 0 : index
    %37 = vector.load %arg7[%c0_17, %c0_18, %c0_19] : memref<1x128x128xbf16, #tpu.memory_space<vmem>>, vector<1x128x128xbf16>
    %38 = vector.shape_cast %37 : vector<1x128x128xbf16> to vector<128x128xbf16>
    %39 = arith.truncf %36 : vector<128x128xf32> to vector<128x128xbf16>
    %cst_20 = arith.constant dense<0.000000e+00> : vector<128x128xf32>
    %40 = tpu.matmul %38, %39, %cst_20 {dimension_numbers = #tpu.dot_dimension_numbers<[1], [0], [0], [1], [0, 0, 1, 1], [], []>} : vector<128x128xbf16>, vector<128x128xbf16>, vector<128x128xf32> -> vector<128x128xf32>
    %c0_21 = arith.constant 0 : index
    %c0_22 = arith.constant 0 : index
    %c0_23 = arith.constant 0 : index
    %41 = vector.load %arg8[%c0_21, %c0_22, %c0_23] : memref<1x128x1xf32, #tpu.memory_space<vmem>>, vector<1x128x1xf32>
    %42 = vector.shape_cast %41 : vector<1x128x1xf32> to vector<128x1xf32>
    %43 = vector.broadcast %42 : vector<128x1xf32> to vector<128x128xf32>
    %44 = arith.addf %40, %43 : vector<128x128xf32>
    %cst_24 = arith.constant 0.000000e+00 : f32
    %45 = vector.broadcast %cst_24 : f32 to vector<128x128xf32>
    %46 = arith.maximumf %44, %45 : vector<128x128xf32>
    %c0_25 = arith.constant 0 : index
    %c0_26 = arith.constant 0 : index
    %c0_27 = arith.constant 0 : index
    %47 = vector.load %arg9[%c0_25, %c0_26, %c0_27] : memref<1x128x128xf32, #tpu.memory_space<vmem>>, vector<1x128x128xf32>
    %48 = vector.shape_cast %47 : vector<1x128x128xf32> to vector<128x128xf32>
    %49 = vector.shape_cast %46 : vector<128x128xf32> to vector<1x128x128xf32>
    tpu.vector_store %arg9[%c0_25, %c0_26, %c0_27], %49 {strides = array<i32>} : memref<1x128x128xf32, #tpu.memory_space<vmem>>, vector<1x128x128xf32>,
    return
  }
  func.func @transform_0(%arg0: i32, %arg1: i32) -> (i32, i32, i32) {
    %c0_i32 = arith.constant 0 : i32
    %c0_i32_0 = arith.constant 0 : i32
    return %arg0, %c0_i32, %arg1 : i32, i32, i32
  }
  func.func @transform_1(%arg0: i32, %arg1: i32) -> (i32, i32, i32) {
    %c0_i32 = arith.constant 0 : i32
    %c0_i32_0 = arith.constant 0 : i32
    return %arg0, %c0_i32, %arg1 : i32, i32, i32
  }
  func.func @transform_2(%arg0: i32, %arg1: i32) -> (i32, i32, i32) {
    %c0_i32 = arith.constant 0 : i32
    %c0_i32_0 = arith.constant 0 : i32
    %c0_i32_1 = arith.constant 0 : i32
    return %arg0, %c0_i32, %c0_i32_0 : i32, i32, i32
  }
  func.func @transform_3(%arg0: i32, %arg1: i32) -> (i32, i32, i32) {
    %c0_i32 = arith.constant 0 : i32
    %c0_i32_0 = arith.constant 0 : i32
    %c0_i32_1 = arith.constant 0 : i32
    return %arg0, %c0_i32, %c0_i32_0 : i32, i32, i32
  }
  func.func @transform_4(%arg0: i32, %arg1: i32) -> (i32, i32, i32) {
    %c0_i32 = arith.constant 0 : i32
    %c0_i32_0 = arith.constant 0 : i32
    %c0_i32_1 = arith.constant 0 : i32
    return %arg0, %c0_i32, %c0_i32_0 : i32, i32, i32
  }
  func.func @transform_5(%arg0: i32, %arg1: i32) -> (i32, i32, i32) {
    %c0_i32 = arith.constant 0 : i32
    %c0_i32_0 = arith.constant 0 : i32
    %c0_i32_1 = arith.constant 0 : i32
    return %arg0, %c0_i32, %c0_i32_0 : i32, i32, i32
  }
  func.func @transform_6(%arg0: i32, %arg1: i32) -> (i32, i32, i32) {
    %c0_i32 = arith.constant 0 : i32
    %c0_i32_0 = arith.constant 0 : i32
    %c0_i32_1 = arith.constant 0 : i32
    return %arg0, %c0_i32, %c0_i32_0 : i32, i32, i32
  }
  func.func @transform_7(%arg0: i32, %arg1: i32) -> (i32, i32, i32) {
    %c0_i32 = arith.constant 0 : i32
    %c0_i32_0 = arith.constant 0 : i32
    return %arg0, %c0_i32, %arg1 : i32, i32, i32
  }
}

</mosaic_0001>

<bundles_post_ra>
// kernel: tpu_custom_call.1
= control target key start
LH: loop header
LB: loop body
LE: loop exit
PB: predicated region body
PF: predicated region fallthrough
CT: control target
= control target key end

     0   :  { %12 = vsyncpa [#allocation3], 0  ;;  %s5445_s0 = inlined_call_operand.vmem [shape: s32[2,1,2048], index: 0, kind: input, shape index: {}]   ;;  %s5446_s1 = inlined_call_operand.vmem [shape: s32[2,1,256], index: 1, kind: input, shape index: {}]   ;;  %s5447_s2 = inlined_call_operand.vmem [shape: bf16[2,64,128], index: 2, kind: input, shape index: {}]   ;;  %s5448_s3 = inlined_call_operand.vmem [shape: bf16[2,128,64], index: 3, kind: input, shape index: {}]   ;;  %s5449_s4 = inlined_call_operand.vmem [shape: f32[2,128,1], index: 4, kind: input, shape index: {}]   ;;  %s5450_s5 = inlined_call_operand.vmem [shape: bf16[2,128,128], index: 5, kind: input, shape index: {}]   ;;  %s5451_s6 = inlined_call_operand.vmem [shape: f32[2,128,1], index: 6, kind: input, shape index: {}]   ;;  %s5452_s7 = inlined_call_operand.hbm [shape: f32[2,128,256], index: 7, kind: output, shape index: {}]  }
   0x1   :  { %14 = vsyncpa [#allocation3 + $0x1], 0  ;;  %s4194_s24 = smov 0   ;;  %s4196_s25 = smov 0  }
   0x2   :  { %s4198_s26 = smov 0   ;;  %s4200_s27 = smov 0  }
   0x3   :  { %s4202_s28 = smov 0   ;;  %s4204_s29 = smov 0  }
   0x4   :  { %s4206_s30 = smov 0   ;;  %s4208_s8 = smov 0  }
   0x5 LB: > { %s3008_s9 = sadd.s32 4294967295, %s4146_s8   ;;  %s3009_s10 = sadd.s32 4294967294, %s4146_s8   ;;  %s4146_s8 = sphi %s4208_s8, %s20_s8   ;;  %s4142_s30 = sphi %s4206_s30, %s5486_s30   ;;  %s4138_s29 = sphi %s4204_s29, %s5485_s29   ;;  %s4134_s28 = sphi %s4202_s28, %s5484_s28   ;;  %s4130_s27 = sphi %s4200_s27, %s5483_s27   ;;  %s4126_s26 = sphi %s4198_s26, %s5482_s26   ;;  %s4122_s25 = sphi %s4196_s25, %s5481_s25   ;;  %s4118_s24 = sphi %s4194_s24, %s5480_s24  }
   0x6   : > { %s29_s11 = sadd.s32 1, %s4138_s29  ;;  %s32_s12 = sadd.s32 1, %s4142_s30 }
   0x7   : > { %p30_p0 = scmp.ge.s32.totalorder %s29_s11, 2  ;;  %p237_p1 = scmp.ne.s32.totalorder %s4126_s26, %s4122_s25 }
   0x8   : > { %p238_p2 = scmp.eq.s32.totalorder %s3008_s9, 3  ;;  %p243_p5 = scmp.ne.s32.totalorder %s4122_s25, %s4118_s24 }
   0x9   : > { %s5488_s11 = smov (%p30_p0, %s29_s11), 0  ;;  %s5490_s12 = smov (!%p30_p0, %s32_s12), %s4142_s30 }
   0xa   : > { %s223_s13 = ssub.s32 %s4138_s29, %s5488_s11  ;;  %p4245_p3 = por %p238_p2, %p237_p1 }
   0xb   : > { %p34_p4 = scmp.ge.s32.totalorder %s5490_s12, 2  ;;  %p244_p6 = scmp.eq.s32.totalorder %s3009_s10, 3 }
   0xc   : > { %p3012_p7 = scmp.ge.s32.totalorder %s4146_s8, 1  ;;  %p324_p9 = scmp.lt.s32.totalorder %s4146_s8, 5 }
   0xd   : > { %s5492_s12 = smov (%p34_p4, %s5490_s12), 0  ;;  %p4254_p8 = por %p244_p6, %p243_p5 }
   0xe   : > { %s222_s16 = ssub.s32 %s4142_s30, %s5492_s12  ;;  %s227_s17 = sadd.s32 1, %s4126_s26 }
   0xf   : > { %s224_s18 = sor.u32 %s223_s13, %s222_s16  ;;  %p325_p10 = pnand %p3012_p7, %p324_p9 }
  0x10   : > { %p225_p11 = scmp.eq.s32.totalorder %s224_s18, 0  ;;  %p392_p12 = scmp.lt.s32.totalorder (!%p325_p10), %s4134_s28, 1  ;;  %v443_v0 = vlaneseq (!%p325_p10)  ;;  %v4148_v12 = vmov (!%p325_p10), 1.0|1.0  }
  0x11   : > { %328 = sbr.rel (%p325_p10) target bundleno = 1288 (0x508), region = 48  ;;  %p402_p13 = scmp.lt.s32.totalorder (!%p325_p10), %s4130_s27, 1 }
  0x12   : > { %s4263_s19 = scalar_select %p225_p11, %s4126_s26, %s227_s17  }
  0x13   : > { %v4270_v1 = vshrl.u32 (!%p325_p10), %v443_v0, 7  ;;  %v1053_v2 = vand.u32 (!%p325_p10), 127, %v443_v0  ;;  %s3014_s16 = sshll.u32 (!%p325_p10), %s4130_s27, 3 }
  0x14   : > { %p4512_p0 = scmp.lt.s32.totalorder (!%p325_p10), %s3014_s16, 15 }
  0x15   : > { %v940_v3 = vadd.s32 (!%p325_p10), 128, %v4270_v1  ;;  %v4275_v4 = vmul.u32 (!%p325_p10), 8, %v1053_v2  ;;  %v941_v5 = vadd.s32 (!%p325_p10), 136, %v4270_v1  ;;  %v972_v7 = vadd.s32 (!%p325_p10), 384, %v4270_v1 }
  0x16   : > { %v973_v9 = vadd.s32 (!%p325_p10), 392, %v4270_v1  ;;  %v4293_v10 = vadd.s32 (!%p325_p10), 8, %v4270_v1  ;;  %v956_v11 = vadd.s32 (!%p325_p10), 256, %v4270_v1  ;;  %v957_v13 = vadd.s32 (!%p325_p10), 264, %v4270_v1 }
  0x17   : > { %vm1071_vm0 = vcmp.ge.s32.totalorder (!%p325_p10), %v940_v3, %v4275_v4  ;;  %vm1072_vm1 = vcmp.ge.s32.totalorder (!%p325_p10), %v941_v5, %v4275_v4  ;;  %vm1103_vm5 = vcmp.ge.s32.totalorder (!%p325_p10), %v972_v7, %v4275_v4  ;;  %vm1055_vm12 = vcmp.ge.s32.totalorder (!%p325_p10), %v4270_v1, %v4275_v4 }
  0x18   : > { %s4268_s20 = scalar_select %p392_p12, %s4134_s28, 1  ;;  %vm1104_vm8 = vcmp.ge.s32.totalorder %v973_v9, %v4275_v4  ;;  %vm1056_vm15 = vcmp.ge.s32.totalorder %v4293_v10, %v4275_v4  ;;  %v942_v14 = vadd.s32 144, %v4270_v1  ;;  %v943_v15 = vadd.s32 152, %v4270_v1 }
  0x19   : > { %s403_s21 = scalar_select %p402_p13, %s4130_s27, 1  ;;  %v974_v16 = vadd.s32 400, %v4270_v1  ;;  %v975_v17 = vadd.s32 408, %v4270_v1  ;;  %v4323_v18 = vadd.s32 16, %v4270_v1  ;;  %v4329_v19 = vadd.s32 24, %v4270_v1 }
  0x1a   : > { %s3016_s22 = sshll.u32 %s4268_s20, 1  ;;  %v958_v20 = vadd.s32 272, %v4270_v1  ;;  %v959_v21 = vadd.s32 280, %v4270_v1  ;;  %v944_v22 = vadd.s32 160, %v4270_v1  ;;  %v945_v23 = vadd.s32 168, %v4270_v1  ;;  %s5494_s16 = smov (!%p4512_p0, %s3014_s16), 15 }
  0x1b   : > { %s405_s23 = sadd.s32 %s3016_s22, %s403_s21  ;;  %v976_v24 = vadd.s32 416, %v4270_v1  ;;  %v977_v25 = vadd.s32 424, %v4270_v1  ;;  %v4359_v26 = vadd.s32 32, %v4270_v1  ;;  %v4365_v27 = vadd.s32 40, %v4270_v1  ;;  %s3015_s18 = sshll.u32 %s4268_s20, 4 }
  0x1c   : > { %s406_s13 = scalar_lea.vmem %s5446_s1, %s405_s23  ;;  %v960_v28 = vadd.s32 288, %v4270_v1  ;;  %v961_v29 = vadd.s32 296, %v4270_v1  ;;  %v946_v30 = vadd.s32 176, %v4270_v1  ;;  %v947_v31 = vadd.s32 184, %v4270_v1  ;;  %s397_s21 = sadd.s32 %s3015_s18, %s5494_s16 }
  0x1d   : > { %v3155_v6 = vld [vmem:[%s406_s13] ss:$0 sm:$0xff]  ;;  %v978_v32 = vadd.s32 432, %v4270_v1  ;;  %v979_v33 = vadd.s32 440, %v4270_v1  ;;  %v4395_v34 = vadd.s32 48, %v4270_v1  ;;  %v4401_v35 = vadd.s32 56, %v4270_v1  ;;  %s398_s9 = scalar_lea.vmem %s5445_s0, %s397_s21 }
  0x1e   : > { %v4284_v8 = vadd.s32 %v3155_v6, %v4275_v4  ;;  %v962_v36 = vadd.s32 304, %v4270_v1  ;;  %v963_v37 = vadd.s32 312, %v4270_v1  ;;  %v948_v38 = vadd.s32 192, %v4270_v1  ;;  %s3573_s10 = sshll.u32 %s4268_s20, 5  ;;  %s3574_s18 = sshll.u32 %s4268_s20, 6 }
  0x1f   : > { %v949_v39 = vadd.s32 200, %v4270_v1  ;;  %v980_v40 = vadd.s32 448, %v4270_v1  ;;  %v981_v41 = vadd.s32 456, %v4270_v1  ;;  %v4431_v42 = vadd.s32 64, %v4270_v1  ;;  %s5244_s17 = scalar_lea.vmem %s5447_s2, %s3573_s10  ;;  %s5280_s23 = scalar_lea.vmem %s5448_s3, %s3574_s18 }
  0x20   : > { %vm1204_vm2 = vcmp.lt.s32.totalorder %v940_v3, %v4284_v8  ;;  %vm1205_vm3 = vcmp.lt.s32.totalorder %v941_v5, %v4284_v8  ;;  %vm1236_vm6 = vcmp.lt.s32.totalorder %v972_v7, %v4284_v8  ;;  %vm1237_vm9 = vcmp.lt.s32.totalorder %v973_v9, %v4284_v8  ;;  %v4562_v9 = vld [vmem:[%s398_s9] sm:$0xff]  ;;  %s3575_s9 = sshll.u32 %s4268_s20, 7  ;;  %s5350_s13 = scalar_lea.vmem %s5450_s5, %s3574_s18 }
  0x21   : > { %vm1332_vm4 = vmand %vm1071_vm0, %vm1204_vm2  ;;  %vm1188_vm13 = vcmp.lt.s32.totalorder %v4270_v1, %v4284_v8  ;;  %vm1189_vm0 = vcmp.lt.s32.totalorder %v4293_v10, %v4284_v8  ;;  %v4437_v43 = vadd.s32 72, %v4270_v1  ;;  %v964_v44 = vadd.s32 320, %v4270_v1  ;;  %s5290_s16 = scalar_lea.vmem %s5449_s4, %s3575_s9  ;;  %s5312_s22 = scalar_lea.vmem %s5451_s6, %s3575_s9 }
  0x22   : > { %vm1333_vm7 = vmand %vm1072_vm1, %vm1205_vm3  ;;  %vm1087_vm3 = vcmp.ge.s32.totalorder %v956_v11, %v4275_v4  ;;  %v965_v45 = vadd.s32 328, %v4270_v1  ;;  %v950_v46 = vadd.s32 208, %v4270_v1  ;;  %v951_v47 = vadd.s32 216, %v4270_v1  ;;  %s388_s20 = sand.u32 1, %s4122_s25  }
  0x23   : > { %vm3300_vm10 = vmpackc.low %vm1333_vm7, %vm1332_vm4  ;;  %vm1220_vm4 = vcmp.lt.s32.totalorder %v956_v11, %v4284_v8  ;;  %vm1221_vm7 = vcmp.lt.s32.totalorder %v957_v13, %v4284_v8  ;;  %v982_v48 = vadd.s32 464, %v4270_v1  ;;  %v983_v49 = vadd.s32 472, %v4270_v1  ;;  %s3013_s18 = sshll.u32 %s388_s20, 7  ;;  %s5393_s10 = scalar_lea.sflag [#allocation3], %s388_s20 }
  0x24   : > { %3578 = vmatprep.subr.msk.bf16.mxu0 %vm3300_vm10, %v4148_v12  ;;  %vm1364_vm11 = vmand %vm1103_vm5, %vm1236_vm6  ;;  %vm1088_vm6 = vcmp.ge.s32.totalorder %v957_v13, %v4275_v4  ;;  %vm1073_vm10 = vcmp.ge.s32.totalorder %v942_v14, %v4275_v4  ;;  %v4467_v50 = vadd.s32 80, %v4270_v1  ;;  %v4473_v51 = vadd.s32 88, %v4270_v1 }
  0x25   : > { %vm1365_vm14 = vmand %vm1104_vm8, %vm1237_vm9  ;;  %v966_v52 = vadd.s32 336, %v4270_v1  ;;  %v967_v53 = vadd.s32 344, %v4270_v1  ;;  %v952_v54 = vadd.s32 224, %v4270_v1  ;;  %v953_v55 = vadd.s32 232, %v4270_v1 }
  0x26   : > { %vm3364_vm1 = vmpackc.low %vm1365_vm14, %vm1364_vm11  ;;  %vm1206_vm11 = vcmp.lt.s32.totalorder %v942_v14, %v4284_v8  ;;  %vm1207_vm14 = vcmp.lt.s32.totalorder %v943_v15, %v4284_v8  ;;  %v984_v56 = vadd.s32 480, %v4270_v1  ;;  %v985_v57 = vadd.s32 488, %v4270_v1 }
  0x27   : > { %3642 = vmatprep.subr.msk.bf16.mxu1 %vm3364_vm1, %v4148_v12  ;;  %vm1316_vm2 = vmand %vm1055_vm12, %vm1188_vm13  ;;  %vm1074_vm13 = vcmp.ge.s32.totalorder %v943_v15, %v4275_v4  ;;  %vm1105_vm1 = vcmp.ge.s32.totalorder %v974_v16, %v4275_v4  ;;  %v4504_v58 = vadd.s32 96, %v4270_v1  ;;  %v4510_v59 = vadd.s32 104, %v4270_v1 }
  0x28   : > { %vm1317_vm5 = vmand %vm1056_vm15, %vm1189_vm0  ;;  %v968_v60 = vadd.s32 352, %v4270_v1  ;;  %v969_v61 = vadd.s32 360, %v4270_v1  ;;  %v954_v62 = vadd.s32 240, %v4270_v1  ;;  %v955_v63 = vadd.s32 248, %v4270_v1 }
  0x29   : > { %vm3284_vm8 = vmpackc.low %vm1317_vm5, %vm1316_vm2  ;;  %vm1238_vm2 = vcmp.lt.s32.totalorder %v974_v16, %v4284_v8  ;;  %vm1239_vm5 = vcmp.lt.s32.totalorder %v975_v17, %v4284_v8  ;;  %v986_v0 = vadd.s32 496, %v4270_v1  ;;  %v987_v2 = vadd.s32 504, %v4270_v1 }
  0x2a   : > { %3579 = vmatpush3.bf16.msk.msra.mxu0 %vm3284_vm8, %v4148_v12  ;;  %vm1348_vm9 = vmand %vm1087_vm3, %vm1220_vm4  ;;  %vm1106_vm4 = vcmp.ge.s32.totalorder %v975_v17, %v4275_v4  ;;  %vm1057_vm8 = vcmp.ge.s32.totalorder %v4323_v18, %v4275_v4  ;;  %v4547_v3 = vadd.s32 112, %v4270_v1  ;;  %v4556_v5 = vadd.s32 120, %v4270_v1 }
  0x2b   : > { %vm1349_vm12 = vmand %vm1088_vm6, %vm1221_vm7  ;;  %v466_v6 = vsub.s32 1, %v4270_v1  ;;  %v970_v7 = vadd.s32 368, %v4270_v1  ;;  %v474_v11 = vsub.s32 3, %v4270_v1  ;;  %v971_v13 = vadd.s32 376, %v4270_v1 }
  0x2c   : > { %vm3348_vm15 = vmpackc.low %vm1349_vm12, %vm1348_vm9  ;;  %vm1190_vm9 = vcmp.lt.s32.totalorder %v4323_v18, %v4284_v8  ;;  %vm1191_vm12 = vcmp.lt.s32.totalorder %v4329_v19, %v4284_v8  ;;  %v462_v14 = vsub.s32 0, %v4270_v1  ;;  %v470_v15 = vsub.s32 2, %v4270_v1 }
  0x2d   : > { %3643 = vmatpush3.bf16.msk.msra.mxu1 %vm3348_vm15, %v4148_v12  ;;  %vm1334_vm0 = vmand %vm1073_vm10, %vm1206_vm11  ;;  %vm1058_vm11 = vcmp.ge.s32.totalorder %v4329_v19, %v4275_v4  ;;  %vm1089_vm15 = vcmp.ge.s32.totalorder %v958_v20, %v4275_v4  ;;  %v4578_v16 = vrot.slane %v4562_v9, %v466_v6  ;;  %v4584_v17 = vrot.slane %v4562_v9, %v474_v11 }
  0x2e   : > { %vm1335_vm3 = vmand %vm1074_vm13, %vm1207_vm14  ;;  %v1010_v6 = vadd.s32 688, %v4270_v1  ;;  %v1042_v11 = vadd.s32 944, %v4270_v1 }
  0x2f   : > { %vm3302_vm6 = vmpackc.low %vm1335_vm3, %vm1334_vm0  ;;  %vm1222_vm0 = vcmp.lt.s32.totalorder %v958_v20, %v4284_v8  ;;  %vm1223_vm3 = vcmp.lt.s32.totalorder %v959_v21, %v4284_v8  ;;  %v4589_v20 = vrot.slane %v4562_v9, %v462_v14  ;;  %v994_v14 = vadd.s32 560, %v4270_v1 }
  0x30   : > { %3580 = vmatprep.subr.msk.bf16.mxu0 %vm3302_vm6, %v4148_v12  ;;  %vm1366_vm7 = vmand %vm1105_vm1, %vm1238_vm2  ;;  %vm1090_vm2 = vcmp.ge.s32.totalorder %v959_v21, %v4275_v4  ;;  %vm1075_vm6 = vcmp.ge.s32.totalorder %v944_v22, %v4275_v4  ;;  %v4592_v21 = vrot.slane %v4562_v9, %v470_v15  ;;  %v995_v15 = vadd.s32 568, %v4270_v1 }
  0x31   : > { %vm1367_vm10 = vmand %vm1106_vm4, %vm1239_vm5 }
  0x32   : > { %vm3366_vm13 = vmpackc.low %vm1367_vm10, %vm1366_vm7  ;;  %vm1208_vm7 = vcmp.lt.s32.totalorder %v944_v22, %v4284_v8  ;;  %vm1209_vm10 = vcmp.lt.s32.totalorder %v945_v23, %v4284_v8  ;;  %v1026_v22 = vadd.s32 816, %v4270_v1 }
  0x33   : > { %3644 = vmatprep.subr.msk.bf16.mxu1 %vm3366_vm13, %v4148_v12  ;;  %vm1318_vm14 = vmand %vm1057_vm8, %vm1190_vm9  ;;  %vm1076_vm9 = vcmp.ge.s32.totalorder %v945_v23, %v4275_v4  ;;  %vm1107_vm13 = vcmp.ge.s32.totalorder %v976_v24, %v4275_v4  ;;  %v1027_v23 = vadd.s32 824, %v4270_v1 }
  0x34   : > { %vm1319_vm1 = vmand %vm1058_vm11, %vm1191_vm12 }
  0x35   : > { %vm3286_vm4 = vmpackc.low %vm1319_vm1, %vm1318_vm14  ;;  %vm1240_vm14 = vcmp.lt.s32.totalorder %v976_v24, %v4284_v8  ;;  %vm1241_vm1 = vcmp.lt.s32.totalorder %v977_v25, %v4284_v8  ;;  %v1004_v24 = vadd.s32 640, %v4270_v1 }
  0x36   : > { %3581 = vmatpush3.bf16.msk.msra.mxu0 %vm3286_vm4, %v4148_v12  ;;  %vm1350_vm5 = vmand %vm1089_vm15, %vm1222_vm0  ;;  %vm1108_vm0 = vcmp.ge.s32.totalorder %v977_v25, %v4275_v4  ;;  %vm1059_vm4 = vcmp.ge.s32.totalorder %v4359_v26, %v4275_v4  ;;  %v1013_v25 = vadd.s32 712, %v4270_v1 }
  0x37   : > { %vm1351_vm8 = vmand %vm1090_vm2, %vm1223_vm3 }
  0x38   : > { %vm3350_vm11 = vmpackc.low %vm1351_vm8, %vm1350_vm5  ;;  %vm1192_vm5 = vcmp.lt.s32.totalorder %v4359_v26, %v4284_v8  ;;  %vm1193_vm8 = vcmp.lt.s32.totalorder %v4365_v27, %v4284_v8 }
  0x39   : > { %3645 = vmatpush3.bf16.msk.msra.mxu1 %vm3350_vm11, %v4148_v12  ;;  %vm1336_vm12 = vmand %vm1075_vm6, %vm1208_vm7  ;;  %vm1060_vm7 = vcmp.ge.s32.totalorder %v4365_v27, %v4275_v4  ;;  %vm1091_vm11 = vcmp.ge.s32.totalorder %v960_v28, %v4275_v4 }
  0x3a   : > { %vm1337_vm15 = vmand %vm1076_vm9, %vm1209_vm10 }
  0x3b   : > { %vm3304_vm2 = vmpackc.low %vm1337_vm15, %vm1336_vm12  ;;  %vm1224_vm12 = vcmp.lt.s32.totalorder %v960_v28, %v4284_v8  ;;  %vm1225_vm15 = vcmp.lt.s32.totalorder %v961_v29, %v4284_v8  ;;  %v1005_v28 = vadd.s32 648, %v4270_v1 }
  0x3c   : > { %3582 = vmatprep.subr.msk.bf16.mxu0 %vm3304_vm2, %v4148_v12  ;;  %vm1368_vm3 = vmand %vm1107_vm13, %vm1240_vm14  ;;  %vm1092_vm14 = vcmp.ge.s32.totalorder %v961_v29, %v4275_v4  ;;  %vm1077_vm2 = vcmp.ge.s32.totalorder %v946_v30, %v4275_v4  ;;  %v1045_v29 = vadd.s32 968, %v4270_v1 }
  0x3d   : > { %vm1369_vm6 = vmand %vm1108_vm0, %vm1241_vm1 }
  0x3e   : > { %vm3368_vm9 = vmpackc.low %vm1369_vm6, %vm1368_vm3  ;;  %vm1210_vm3 = vcmp.lt.s32.totalorder %v946_v30, %v4284_v8  ;;  %vm1211_vm6 = vcmp.lt.s32.totalorder %v947_v31, %v4284_v8  ;;  %v5464_v30 = vmov 0 }
  0x3f   : > { %3646 = vmatprep.subr.msk.bf16.mxu1 %vm3368_vm9, %v4148_v12  ;;  %vm1320_vm10 = vmand %vm1059_vm4, %vm1192_vm5  ;;  %vm1078_vm5 = vcmp.ge.s32.totalorder %v947_v31, %v4275_v4  ;;  %vm1109_vm9 = vcmp.ge.s32.totalorder %v978_v32, %v4275_v4  ;;  %v1036_v31 = vadd.s32 896, %v4270_v1 }
  0x40   : > { %vm1321_vm13 = vmand %vm1060_vm7, %vm1193_vm8 }
  0x41   : > { %vm3288_vm0 = vmpackc.low %vm1321_vm13, %vm1320_vm10  ;;  %vm1242_vm10 = vcmp.lt.s32.totalorder %v978_v32, %v4284_v8  ;;  %vm1243_vm13 = vcmp.lt.s32.totalorder %v979_v33, %v4284_v8  ;;  %v5466_v32 = vmov 0 }
  0x42   : > { %3583 = vmatpush3.bf16.msk.msra.mxu0 %vm3288_vm0, %v4148_v12  ;;  %vm1352_vm1 = vmand %vm1091_vm11, %vm1224_vm12  ;;  %vm1110_vm12 = vcmp.ge.s32.totalorder %v979_v33, %v4275_v4  ;;  %vm1061_vm0 = vcmp.ge.s32.totalorder %v4395_v34, %v4275_v4  ;;  %v1037_v33 = vadd.s32 904, %v4270_v1 }
  0x43   : > { %vm1353_vm4 = vmand %vm1092_vm14, %vm1225_vm15 }
  0x44   : > { %vm3352_vm7 = vmpackc.low %vm1353_vm4, %vm1352_vm1  ;;  %vm1194_vm1 = vcmp.lt.s32.totalorder %v4395_v34, %v4284_v8  ;;  %vm1195_vm4 = vcmp.lt.s32.totalorder %v4401_v35, %v4284_v8 }
  0x45   : > { %3647 = vmatpush3.bf16.msk.msra.mxu1 %vm3352_vm7, %v4148_v12  ;;  %vm1338_vm8 = vmand %vm1077_vm2, %vm1210_vm3  ;;  %vm1062_vm3 = vcmp.ge.s32.totalorder %v4401_v35, %v4275_v4  ;;  %vm1093_vm7 = vcmp.ge.s32.totalorder %v962_v36, %v4275_v4 }
  0x46   : > { %vm1339_vm11 = vmand %vm1078_vm5, %vm1211_vm6 }
  0x47   : > { %vm3306_vm14 = vmpackc.low %vm1339_vm11, %vm1338_vm8  ;;  %vm1226_vm8 = vcmp.lt.s32.totalorder %v962_v36, %v4284_v8  ;;  %vm1227_vm11 = vcmp.lt.s32.totalorder %v963_v37, %v4284_v8  ;;  %v5468_v36 = vmov 0 }
  0x48   : > { %3584 = vmatprep.subr.msk.bf16.mxu0 %vm3306_vm14, %v4148_v12  ;;  %vm1370_vm15 = vmand %vm1109_vm9, %vm1242_vm10  ;;  %vm1094_vm10 = vcmp.ge.s32.totalorder %v963_v37, %v4275_v4  ;;  %vm1079_vm14 = vcmp.ge.s32.totalorder %v948_v38, %v4275_v4  ;;  %v5470_v37 = vmov 0 }
  0x49   : > { %vm1371_vm2 = vmand %vm1110_vm12, %vm1243_vm13 }
  0x4a   : > { %vm3370_vm5 = vmpackc.low %vm1371_vm2, %vm1370_vm15  ;;  %vm1212_vm15 = vcmp.lt.s32.totalorder %v948_v38, %v4284_v8  ;;  %vm1213_vm2 = vcmp.lt.s32.totalorder %v949_v39, %v4284_v8  ;;  %v988_v38 = vadd.s32 512, %v4270_v1 }
  0x4b   : > { %3648 = vmatprep.subr.msk.bf16.mxu1 %vm3370_vm5, %v4148_v12  ;;  %vm1322_vm6 = vmand %vm1061_vm0, %vm1194_vm1  ;;  %vm1080_vm1 = vcmp.ge.s32.totalorder %v949_v39, %v4275_v4  ;;  %vm1111_vm5 = vcmp.ge.s32.totalorder %v980_v40, %v4275_v4  ;;  %v989_v39 = vadd.s32 520, %v4270_v1 }
  0x4c   : > { %vm1323_vm9 = vmand %vm1062_vm3, %vm1195_vm4 }
  0x4d   : > { %vm3290_vm12 = vmpackc.low %vm1323_vm9, %vm1322_vm6  ;;  %vm1244_vm6 = vcmp.lt.s32.totalorder %v980_v40, %v4284_v8  ;;  %vm1245_vm9 = vcmp.lt.s32.totalorder %v981_v41, %v4284_v8  ;;  %v1020_v40 = vadd.s32 768, %v4270_v1 }
  0x4e   : > { %3585 = vmatpush3.bf16.msk.msra.mxu0 %vm3290_vm12, %v4148_v12  ;;  %vm1354_vm13 = vmand %vm1093_vm7, %vm1226_vm8  ;;  %vm1112_vm8 = vcmp.ge.s32.totalorder %v981_v41, %v4275_v4  ;;  %vm1063_vm12 = vcmp.ge.s32.totalorder %v4431_v42, %v4275_v4  ;;  %v1021_v41 = vadd.s32 776, %v4270_v1 }
  0x4f   : > { %vm1355_vm0 = vmand %vm1094_vm10, %vm1227_vm11 }
  0x50   : > { %vm3354_vm3 = vmpackc.low %vm1355_vm0, %vm1354_vm13  ;;  %vm1196_vm13 = vcmp.lt.s32.totalorder %v4431_v42, %v4284_v8  ;;  %vm1197_vm0 = vcmp.lt.s32.totalorder %v4437_v43, %v4284_v8 }
  0x51   : > { %3649 = vmatpush3.bf16.msk.msra.mxu1 %vm3354_vm3, %v4148_v12  ;;  %vm1340_vm4 = vmand %vm1079_vm14, %vm1212_vm15  ;;  %vm1064_vm15 = vcmp.ge.s32.totalorder %v4437_v43, %v4275_v4  ;;  %vm1095_vm3 = vcmp.ge.s32.totalorder %v964_v44, %v4275_v4 }
  0x52   : > { %vm1341_vm7 = vmand %vm1080_vm1, %vm1213_vm2 }
  0x53   : > { %vm3308_vm10 = vmpackc.low %vm1341_vm7, %vm1340_vm4  ;;  %vm1228_vm4 = vcmp.lt.s32.totalorder %v964_v44, %v4284_v8  ;;  %vm1229_vm7 = vcmp.lt.s32.totalorder %v965_v45, %v4284_v8  ;;  %v1030_v44 = vadd.s32 848, %v4270_v1 }
  0x54   : > { %3586 = vmatprep.subr.msk.bf16.mxu0 %vm3308_vm10, %v4148_v12  ;;  %vm1372_vm11 = vmand %vm1111_vm5, %vm1244_vm6  ;;  %vm1096_vm6 = vcmp.ge.s32.totalorder %v965_v45, %v4275_v4  ;;  %vm1081_vm10 = vcmp.ge.s32.totalorder %v950_v46, %v4275_v4  ;;  %v1031_v45 = vadd.s32 856, %v4270_v1 }
  0x55   : > { %vm1373_vm14 = vmand %vm1112_vm8, %vm1245_vm9 }
  0x56   : > { %vm3372_vm1 = vmpackc.low %vm1373_vm14, %vm1372_vm11  ;;  %vm1214_vm11 = vcmp.lt.s32.totalorder %v950_v46, %v4284_v8  ;;  %vm1215_vm14 = vcmp.lt.s32.totalorder %v951_v47, %v4284_v8  ;;  %v1006_v46 = vadd.s32 656, %v4270_v1 }
  0x57   : > { %3650 = vmatprep.subr.msk.bf16.mxu1 %vm3372_vm1, %v4148_v12  ;;  %vm1324_vm2 = vmand %vm1063_vm12, %vm1196_vm13  ;;  %vm1082_vm13 = vcmp.ge.s32.totalorder %v951_v47, %v4275_v4  ;;  %vm1113_vm1 = vcmp.ge.s32.totalorder %v982_v48, %v4275_v4  ;;  %v1007_v47 = vadd.s32 664, %v4270_v1 }
  0x58   : > { %vm1325_vm5 = vmand %vm1064_vm15, %vm1197_vm0 }
  0x59   : > { %vm3292_vm8 = vmpackc.low %vm1325_vm5, %vm1324_vm2  ;;  %vm1246_vm2 = vcmp.lt.s32.totalorder %v982_v48, %v4284_v8  ;;  %vm1247_vm5 = vcmp.lt.s32.totalorder %v983_v49, %v4284_v8  ;;  %v1038_v48 = vadd.s32 912, %v4270_v1 }
  0x5a   : > { %3587 = vmatpush3.bf16.msk.msra.mxu0 %vm3292_vm8, %v4148_v12  ;;  %vm1356_vm9 = vmand %vm1095_vm3, %vm1228_vm4  ;;  %vm1114_vm4 = vcmp.ge.s32.totalorder %v983_v49, %v4275_v4  ;;  %vm1065_vm8 = vcmp.ge.s32.totalorder %v4467_v50, %v4275_v4  ;;  %v1039_v49 = vadd.s32 920, %v4270_v1 }
  0x5b   : > { %vm1357_vm12 = vmand %vm1096_vm6, %vm1229_vm7 }
  0x5c   : > { %vm3356_vm15 = vmpackc.low %vm1357_vm12, %vm1356_vm9  ;;  %vm1198_vm9 = vcmp.lt.s32.totalorder %v4467_v50, %v4284_v8  ;;  %vm1199_vm12 = vcmp.lt.s32.totalorder %v4473_v51, %v4284_v8 }
  0x5d   : > { %3651 = vmatpush3.bf16.msk.msra.mxu1 %vm3356_vm15, %v4148_v12  ;;  %vm1342_vm0 = vmand %vm1081_vm10, %vm1214_vm11  ;;  %vm1066_vm11 = vcmp.ge.s32.totalorder %v4473_v51, %v4275_v4  ;;  %vm1097_vm15 = vcmp.ge.s32.totalorder %v966_v52, %v4275_v4 }
  0x5e   : > { %vm1343_vm3 = vmand %vm1082_vm13, %vm1215_vm14 }
  0x5f   : > { %vm3310_vm6 = vmpackc.low %vm1343_vm3, %vm1342_vm0  ;;  %vm1230_vm0 = vcmp.lt.s32.totalorder %v966_v52, %v4284_v8  ;;  %vm1231_vm3 = vcmp.lt.s32.totalorder %v967_v53, %v4284_v8  ;;  %v990_v52 = vadd.s32 528, %v4270_v1 }
  0x60   : > { %3588 = vmatprep.subr.msk.bf16.mxu0 %vm3310_vm6, %v4148_v12  ;;  %vm1374_vm7 = vmand %vm1113_vm1, %vm1246_vm2  ;;  %vm1098_vm2 = vcmp.ge.s32.totalorder %v967_v53, %v4275_v4  ;;  %vm1083_vm6 = vcmp.ge.s32.totalorder %v952_v54, %v4275_v4  ;;  %v991_v53 = vadd.s32 536, %v4270_v1 }
  0x61   : > { %vm1375_vm10 = vmand %vm1114_vm4, %vm1247_vm5 }
  0x62   : > { %vm3374_vm13 = vmpackc.low %vm1375_vm10, %vm1374_vm7  ;;  %vm1216_vm7 = vcmp.lt.s32.totalorder %v952_v54, %v4284_v8  ;;  %vm1217_vm10 = vcmp.lt.s32.totalorder %v953_v55, %v4284_v8  ;;  %v1022_v54 = vadd.s32 784, %v4270_v1 }
  0x63   : > { %3652 = vmatprep.subr.msk.bf16.mxu1 %vm3374_vm13, %v4148_v12  ;;  %vm1326_vm14 = vmand %vm1065_vm8, %vm1198_vm9  ;;  %vm1084_vm9 = vcmp.ge.s32.totalorder %v953_v55, %v4275_v4  ;;  %vm1115_vm13 = vcmp.ge.s32.totalorder %v984_v56, %v4275_v4  ;;  %v1023_v55 = vadd.s32 792, %v4270_v1 }
  0x64   : > { %vm1327_vm1 = vmand %vm1066_vm11, %vm1199_vm12 }
  0x65   : > { %vm3294_vm4 = vmpackc.low %vm1327_vm1, %vm1326_vm14  ;;  %vm1248_vm14 = vcmp.lt.s32.totalorder %v984_v56, %v4284_v8  ;;  %vm1249_vm1 = vcmp.lt.s32.totalorder %v985_v57, %v4284_v8  ;;  %v1008_v56 = vadd.s32 672, %v4270_v1 }
  0x66   : > { %3589 = vmatpush3.bf16.msk.msra.mxu0 %vm3294_vm4, %v4148_v12  ;;  %vm1358_vm5 = vmand %vm1097_vm15, %vm1230_vm0  ;;  %vm1116_vm0 = vcmp.ge.s32.totalorder %v985_v57, %v4275_v4  ;;  %vm1067_vm4 = vcmp.ge.s32.totalorder %v4504_v58, %v4275_v4  ;;  %v1009_v57 = vadd.s32 680, %v4270_v1 }
  0x67   : > { %vm1359_vm8 = vmand %vm1098_vm2, %vm1231_vm3 }
  0x68   : > { %vm3358_vm11 = vmpackc.low %vm1359_vm8, %vm1358_vm5  ;;  %vm1200_vm5 = vcmp.lt.s32.totalorder %v4504_v58, %v4284_v8  ;;  %vm1201_vm8 = vcmp.lt.s32.totalorder %v4510_v59, %v4284_v8 }
  0x69   : > { %3653 = vmatpush3.bf16.msk.msra.mxu1 %vm3358_vm11, %v4148_v12  ;;  %vm1344_vm12 = vmand %vm1083_vm6, %vm1216_vm7  ;;  %vm1068_vm7 = vcmp.ge.s32.totalorder %v4510_v59, %v4275_v4  ;;  %vm1099_vm11 = vcmp.ge.s32.totalorder %v968_v60, %v4275_v4 }
  0x6a   : > { %vm1345_vm15 = vmand %vm1084_vm9, %vm1217_vm10 }
  0x6b   : > { %vm3312_vm2 = vmpackc.low %vm1345_vm15, %vm1344_vm12  ;;  %vm1232_vm12 = vcmp.lt.s32.totalorder %v968_v60, %v4284_v8  ;;  %vm1233_vm15 = vcmp.lt.s32.totalorder %v969_v61, %v4284_v8  ;;  %v1040_v60 = vadd.s32 928, %v4270_v1 }
  0x6c   : > { %3590 = vmatprep.subr.msk.bf16.mxu0 %vm3312_vm2, %v4148_v12  ;;  %vm1376_vm3 = vmand %vm1115_vm13, %vm1248_vm14  ;;  %vm1100_vm14 = vcmp.ge.s32.totalorder %v969_v61, %v4275_v4  ;;  %vm1085_vm2 = vcmp.ge.s32.totalorder %v954_v62, %v4275_v4  ;;  %v1041_v61 = vadd.s32 936, %v4270_v1 }
  0x6d   : > { %vm1377_vm6 = vmand %vm1116_vm0, %vm1249_vm1 }
  0x6e   : > { %vm3376_vm9 = vmpackc.low %vm1377_vm6, %vm1376_vm3  ;;  %vm1218_vm3 = vcmp.lt.s32.totalorder %v954_v62, %v4284_v8  ;;  %vm1219_vm6 = vcmp.lt.s32.totalorder %v955_v63, %v4284_v8  ;;  %v992_v62 = vadd.s32 544, %v4270_v1 }
  0x6f   : > { %3654 = vmatprep.subr.msk.bf16.mxu1 %vm3376_vm9, %v4148_v12  ;;  %vm1328_vm10 = vmand %vm1067_vm4, %vm1200_vm5  ;;  %vm1086_vm5 = vcmp.ge.s32.totalorder %v955_v63, %v4275_v4  ;;  %vm1117_vm9 = vcmp.ge.s32.totalorder %v986_v0, %v4275_v4  ;;  %v993_v63 = vadd.s32 552, %v4270_v1 }
  0x70   : > { %vm1329_vm13 = vmand %vm1068_vm7, %vm1201_vm8 }
  0x71   : > { %vm3296_vm0 = vmpackc.low %vm1329_vm13, %vm1328_vm10  ;;  %vm1250_vm10 = vcmp.lt.s32.totalorder %v986_v0, %v4284_v8  ;;  %vm1251_vm13 = vcmp.lt.s32.totalorder %v987_v2, %v4284_v8  ;;  %v1024_v0 = vadd.s32 800, %v4270_v1 }
  0x72   : > { %3591 = vmatpush3.bf16.msk.msra.mxu0 %vm3296_vm0, %v4148_v12  ;;  %vm1360_vm1 = vmand %vm1099_vm11, %vm1232_vm12  ;;  %vm1118_vm12 = vcmp.ge.s32.totalorder %v987_v2, %v4275_v4  ;;  %vm1069_vm0 = vcmp.ge.s32.totalorder %v4547_v3, %v4275_v4  ;;  %v1025_v2 = vadd.s32 808, %v4270_v1 }
  0x73   : > { %vm1361_vm4 = vmand %vm1100_vm14, %vm1233_vm15 }
  0x74   : > { %vm3360_vm7 = vmpackc.low %vm1361_vm4, %vm1360_vm1  ;;  %vm1202_vm1 = vcmp.lt.s32.totalorder %v4547_v3, %v4284_v8  ;;  %vm1203_vm4 = vcmp.lt.s32.totalorder %v4556_v5, %v4284_v8 }
  0x75   : > { %3655 = vmatpush3.bf16.msk.msra.mxu1 %vm3360_vm7, %v4148_v12  ;;  %vm1346_vm8 = vmand %vm1085_vm2, %vm1218_vm3  ;;  %vm1070_vm3 = vcmp.ge.s32.totalorder %v4556_v5, %v4275_v4  ;;  %vm1101_vm7 = vcmp.ge.s32.totalorder %v970_v7, %v4275_v4 }
  0x76   : > { %vm1347_vm11 = vmand %vm1086_vm5, %vm1219_vm6 }
  0x77   : > { %vm3314_vm14 = vmpackc.low %vm1347_vm11, %vm1346_vm8  ;;  %vm1234_vm8 = vcmp.lt.s32.totalorder %v970_v7, %v4284_v8  ;;  %vm1235_vm11 = vcmp.lt.s32.totalorder %v971_v13, %v4284_v8  ;;  %v1011_v7 = vadd.s32 696, %v4270_v1 }
  0x78   : > { %3592 = vmatprep.subr.msk.bf16.mxu0 %vm3314_vm14, %v4148_v12  ;;  %vm1378_vm15 = vmand %vm1117_vm9, %vm1250_vm10  ;;  %vm1102_vm10 = vcmp.ge.s32.totalorder %v971_v13, %v4275_v4  ;;  %vm493_vm14 = vcmp.eq.s32.totalorder %v4578_v16, %v4270_v1  ;;  %v1043_v13 = vadd.s32 952, %v4270_v1 }
  0x79   : > { %vm1379_vm2 = vmand %vm1118_vm12, %vm1251_vm13 }
  0x7a   : > { %vm3378_vm5 = vmpackc.low %vm1379_vm2, %vm1378_vm15  ;;  %vm501_vm15 = vcmp.eq.s32.totalorder %v4578_v16, %v4293_v10  ;;  %vm503_vm2 = vcmp.eq.s32.totalorder %v4584_v17, %v4293_v10 }
  0x7b   : > { %3656 = vmatprep.subr.msk.bf16.mxu1 %vm3378_vm5, %v4148_v12  ;;  %vm1330_vm6 = vmand %vm1069_vm0, %vm1202_vm1  ;;  %vm495_vm1 = vcmp.eq.s32.totalorder %v4584_v17, %v4270_v1  ;;  %vm500_vm5 = vcmp.eq.s32.totalorder %v4589_v20, %v4293_v10 }
  0x7c   : > { %vm1331_vm9 = vmand %vm1070_vm3, %vm1203_vm4  ;;  %vm492_vm4 = vcmp.eq.s32.totalorder %v4589_v20, %v4270_v1 }
  0x7d   : > { %vm3298_vm12 = vmpackc.low %vm1331_vm9, %vm1330_vm6 }
  0x7e   : > { %3593 = vmatpush3.bf16.msk.msra.mxu0 %vm3298_vm12, %v4148_v12  ;;  %vm1362_vm13 = vmand %vm1101_vm7, %vm1234_vm8  ;;  %vm494_vm7 = vcmp.eq.s32.totalorder %v4592_v21, %v4270_v1  ;;  %vm502_vm8 = vcmp.eq.s32.totalorder %v4592_v21, %v4293_v10 }
  0x7f   : > { %vm1363_vm0 = vmand %vm1102_vm10, %vm1235_vm11  ;;  %vm509_vm10 = vcmp.eq.s32.totalorder %v4578_v16, %v4323_v18  ;;  %vm517_vm11 = vcmp.eq.s32.totalorder %v4578_v16, %v4329_v19 }
  0x80   : > { %vm3362_vm3 = vmpackc.low %vm1363_vm0, %vm1362_vm13  ;;  %vm511_vm13 = vcmp.eq.s32.totalorder %v4584_v17, %v4323_v18 }
  0x81   : > { %3657 = vmatpush3.bf16.msk.msra.mxu1 %vm3362_vm3, %v4148_v12  ;;  %vm3316_vm6 = vmpackc.low %vm501_vm15, %vm493_vm14  ;;  %vm519_vm14 = vcmp.eq.s32.totalorder %v4584_v17, %v4329_v19 }
  0x82   : > { %3317 = vmatprep.mubr.msk.bf16.mxu0 %vm3316_vm6, %v4148_v12  ;;  %vm3380_vm9 = vmpackc.low %vm503_vm2, %vm495_vm1  ;;  %vm508_vm1 = vcmp.eq.s32.totalorder %v4589_v20, %v4323_v18  ;;  %vm516_vm2 = vcmp.eq.s32.totalorder %v4589_v20, %v4329_v19  ;;  %vm525_vm6 = vcmp.eq.s32.totalorder %v4578_v16, %v4359_v26 }
  0x83   : > { %3381 = vmatprep.mubr.msk.bf16.mxu1 %vm3380_vm9, %v4148_v12  ;;  %vm3318_vm12 = vmpackc.low %vm500_vm5, %vm492_vm4  ;;  %vm510_vm4 = vcmp.eq.s32.totalorder %v4592_v21, %v4323_v18  ;;  %vm518_vm5 = vcmp.eq.s32.totalorder %v4592_v21, %v4329_v19  ;;  %vm527_vm9 = vcmp.eq.s32.totalorder %v4584_v17, %v4359_v26 }
  0x84   : > { %3319 = vmatmul.mubr.msk.bf16.vlgmr.msra.gmra.mrb[0].mxu0 %vm3318_vm12, %v4148_v12  ;;  %vm3382_vm15 = vmpackc.low %vm502_vm8, %vm494_vm7  ;;  %vm533_vm7 = vcmp.eq.s32.totalorder %v4578_v16, %v4365_v27 }
  0x85   : > { %3383 = vmatmul.mubr.msk.bf16.vlgmr.msra.gmra.mrb[0].mxu1 %vm3382_vm15, %v4148_v12  ;;  %vm3320_vm0 = vmpackc.low %vm517_vm11, %vm509_vm10  ;;  %vm535_vm10 = vcmp.eq.s32.totalorder %v4584_v17, %v4365_v27 }
  0x86   : > { %3321 = vmatprep.mubr.msk.bf16.mxu0 %vm3320_vm0, %v4148_v12  ;;  %vm3384_vm3 = vmpackc.low %vm519_vm14, %vm511_vm13  ;;  %vm524_vm13 = vcmp.eq.s32.totalorder %v4589_v20, %v4359_v26  ;;  %vm532_vm14 = vcmp.eq.s32.totalorder %v4589_v20, %v4365_v27  ;;  %vm526_vm0 = vcmp.eq.s32.totalorder %v4592_v21, %v4359_v26 }
  0x87   : > { %3385 = vmatprep.mubr.msk.bf16.mxu1 %vm3384_vm3, %v4148_v12  ;;  %vm3322_vm8 = vmpackc.low %vm516_vm2, %vm508_vm1  ;;  %vm534_vm1 = vcmp.eq.s32.totalorder %v4592_v21, %v4365_v27  ;;  %vm541_vm2 = vcmp.eq.s32.totalorder %v4578_v16, %v4395_v34  ;;  %vm549_vm3 = vcmp.eq.s32.totalorder %v4578_v16, %v4401_v35 }
  0x88   : > { %vm3386_vm11 = vmpackc.low %vm518_vm5, %vm510_vm4  ;;  %vm543_vm5 = vcmp.eq.s32.totalorder %v4584_v17, %v4395_v34 }
  0x89   : > { %vm3324_vm12 = vmpackc.low %vm533_vm7, %vm525_vm6  ;;  %vm551_vm6 = vcmp.eq.s32.totalorder %v4584_v17, %v4401_v35 }
  0x8a   : > { %vm3388_vm15 = vmpackc.low %vm535_vm10, %vm527_vm9  ;;  %vm548_vm9 = vcmp.eq.s32.totalorder %v4589_v20, %v4401_v35 }
  0x8b   : > { %vm4657_vm4 = vmpackc.low %vm532_vm14, %vm524_vm13  ;;  %vm557_vm14 = vcmp.eq.s32.totalorder %v4578_v16, %v4431_v42 }
  0x8c   : > { %3323 = vmatmul.mubr.msk.bf16.gmra.mrb[4].mxu0 %vm3322_vm8, %v4148_v12  ;;  %vm4666_vm7 = vmpackc.low %vm534_vm1, %vm526_vm0  ;;  %vm540_vm8 = vcmp.eq.s32.totalorder %v4589_v20, %v4395_v34  ;;  %vm559_vm1 = vcmp.eq.s32.totalorder %v4584_v17, %v4431_v42 }
  0x8d   : > { %3387 = vmatmul.mubr.msk.bf16.gmra.mrb[4].mxu1 %vm3386_vm11, %v4148_v12  ;;  %3325 = vmatprep.mubr.msk.bf16.mxu0 %vm3324_vm12, %v4148_v12  ;;  %vm4675_vm10 = vmpackc.low %vm549_vm3, %vm541_vm2  ;;  %vm542_vm11 = vcmp.eq.s32.totalorder %v4592_v21, %v4395_v34  ;;  %vm550_vm12 = vcmp.eq.s32.totalorder %v4592_v21, %v4401_v35  ;;  %vm567_vm2 = vcmp.eq.s32.totalorder %v4584_v17, %v4437_v43 }
  0x8e   : > { %3389 = vmatprep.mubr.msk.bf16.mxu1 %vm3388_vm15, %v4148_v12  ;;  %vm4684_vm13 = vmpackc.low %vm551_vm6, %vm543_vm5  ;;  %vm565_vm15 = vcmp.eq.s32.totalorder %v4578_v16, %v4437_v43  ;;  %vm1135_vm5 = vcmp.ge.s32.totalorder %v1004_v24, %v4275_v4  ;;  %vm1268_vm6 = vcmp.lt.s32.totalorder %v1004_v24, %v4284_v8  ;;  %v1012_v24 = vadd.s32 704, %v4270_v1 }
  0x8f   : > { %vm4692_vm0 = vmpackc.low %vm548_vm9, %vm540_vm8  ;;  %vm1136_vm9 = vcmp.ge.s32.totalorder %v1005_v28, %v4275_v4 }
  0x90   : > { %v5465_v30 = vsel %vm4692_vm0, 4294967295, %v5464_v30  ;;  %vm4701_vm3 = vmpackc.low %vm550_vm12, %vm542_vm11  ;;  %vm1269_vm0 = vcmp.lt.s32.totalorder %v1005_v28, %v4284_v8  ;;  %v1044_v28 = vadd.s32 960, %v4270_v1 }
  0x91   : > { %v5467_v32 = vsel %vm4701_vm3, 4294967295, %v5466_v32  ;;  %vm4708_vm8 = vmpackc.low %vm565_vm15, %vm557_vm14  ;;  %vm1167_vm14 = vcmp.ge.s32.totalorder %v1036_v31, %v4275_v4  ;;  %vm1300_vm15 = vcmp.lt.s32.totalorder %v1036_v31, %v4284_v8  ;;  %v997_v31 = vadd.s32 584, %v4270_v1 }
  0x92   : > { %v5469_v36 = vsel %vm4708_vm8, 4294967295, %v5468_v36  ;;  %vm4717_vm11 = vmpackc.low %vm567_vm2, %vm559_vm1  ;;  %vm1301_vm2 = vcmp.lt.s32.totalorder %v1037_v33, %v4284_v8  ;;  %vm1119_vm8 = vcmp.ge.s32.totalorder %v988_v38, %v4275_v4 }
  0x93   : > { %v5471_v37 = vsel %vm4717_vm11, 4294967295, %v5470_v37  ;;  %vm1396_vm12 = vmand %vm1135_vm5, %vm1268_vm6  ;;  %vm558_vm5 = vcmp.eq.s32.totalorder %v4592_v21, %v4431_v42  ;;  %vm566_vm6 = vcmp.eq.s32.totalorder %v4592_v21, %v4437_v43 }
  0x94   : > { %3327 = vmatmul.mubr.msk.bf16.gmra.mrb[8].mxu0 %vm4657_vm4, %v4148_v12  ;;  %vm556_vm4 = vcmp.eq.s32.totalorder %v4589_v20, %v4431_v42  ;;  %vm1397_vm1 = vmand %vm1136_vm9, %vm1269_vm0  ;;  %vm1252_vm0 = vcmp.lt.s32.totalorder %v988_v38, %v4284_v8  ;;  %v1046_v38 = vadd.s32 976, %v4270_v1 }
  0x95   : > { %3391 = vmatmul.mubr.msk.bf16.gmra.mrb[8].mxu1 %vm4666_vm7, %v4148_v12  ;;  %3329 = vmatprep.mubr.msk.bf16.mxu0 %vm4675_vm10, %v4148_v12  ;;  %vm564_vm7 = vcmp.eq.s32.totalorder %v4589_v20, %v4437_v43  ;;  %vm1168_vm10 = vcmp.ge.s32.totalorder %v1037_v33, %v4275_v4  ;;  %vm3428_vm11 = vmpackc.low %vm1397_vm1, %vm1396_vm12  ;;  %vm1120_vm1 = vcmp.ge.s32.totalorder %v989_v39, %v4275_v4  ;;  %v1029_v33 = vadd.s32 840, %v4270_v1 }
  0x96   : > { %3393 = vmatprep.mubr.msk.bf16.mxu1 %vm4684_vm13, %v4148_v12  ;;  %3706 = vmatprep.subr.msk.bf16.mxu0 %vm3428_vm11, %v4148_v12  ;;  %vm1428_vm13 = vmand %vm1167_vm14, %vm1300_vm15  ;;  %vm1253_vm12 = vcmp.lt.s32.totalorder %v989_v39, %v4284_v8  ;;  %v1047_v39 = vadd.s32 984, %v4270_v1 }
  0x97   : > { %vm4749_vm9 = vmpackc.low %vm564_vm7, %vm556_vm4  ;;  %vm1151_vm4 = vcmp.ge.s32.totalorder %v1020_v40, %v4275_v4  ;;  %vm1284_vm7 = vcmp.lt.s32.totalorder %v1020_v40, %v4284_v8  ;;  %v998_v40 = vadd.s32 592, %v4270_v1 }
  0x98   : > { %vm1429_vm3 = vmand %vm1168_vm10, %vm1301_vm2  ;;  %vm5476_vm10 = vnez %v5465_v30  ;;  %v996_v30 = vadd.s32 576, %v4270_v1 }
  0x99   : > { %vm4755_vm11 = vmpackc.low %vm566_vm6, %vm558_vm5  ;;  %vm1152_vm5 = vcmp.ge.s32.totalorder %v1021_v41, %v4275_v4  ;;  %vm5477_vm6 = vnez %v5467_v32  ;;  %v1028_v32 = vadd.s32 832, %v4270_v1 }
  0x9a   : > { %vm3492_vm14 = vmpackc.low %vm1429_vm3, %vm1428_vm13  ;;  %vm1285_vm3 = vcmp.lt.s32.totalorder %v1021_v41, %v4284_v8  ;;  %v999_v41 = vadd.s32 600, %v4270_v1 }
  0x9b   : > { %3770 = vmatprep.subr.msk.bf16.mxu1 %vm3492_vm14, %v4148_v12  ;;  %vm1380_vm15 = vmand %vm1119_vm8, %vm1252_vm0  ;;  %vm5478_vm8 = vnez %v5469_v36  ;;  %vm5479_vm0 = vnez %v5471_v37  ;;  %vm1270_vm14 = vcmp.lt.s32.totalorder %v1006_v46, %v4284_v8  ;;  %v1014_v36 = vadd.s32 720, %v4270_v1 }
  0x9c   : > { %3331 = vmatmul.mubr.msk.bf16.gmra.mrb[12].mxu0 %vm5476_vm10, %v4148_v12  ;;  %vm1381_vm2 = vmand %vm1120_vm1, %vm1253_vm12  ;;  %vm1137_vm12 = vcmp.ge.s32.totalorder %v1006_v46, %v4275_v4  ;;  %v1015_v37 = vadd.s32 728, %v4270_v1  ;;  %v1016_v46 = vadd.s32 736, %v4270_v1 }
  0x9d   : > { %3395 = vmatmul.mubr.msk.bf16.gmra.mrb[12].mxu1 %vm5477_vm6, %v4148_v12  ;;  %3333 = vmatprep.mubr.msk.bf16.mxu0 %vm5478_vm8, %v4148_v12  ;;  %vm3412_vm13 = vmpackc.low %vm1381_vm2, %vm1380_vm15  ;;  %vm1138_vm6 = vcmp.ge.s32.totalorder %v1007_v47, %v4275_v4  ;;  %vm1271_vm15 = vcmp.lt.s32.totalorder %v1007_v47, %v4284_v8  ;;  %v1017_v47 = vadd.s32 744, %v4270_v1 }
  0x9e   : > { %3397 = vmatprep.mubr.msk.bf16.mxu1 %vm5479_vm0, %v4148_v12  ;;  %3707 = vmatpush3.bf16.msk.msra.mxu0 %vm3412_vm13, %v4148_v12  ;;  %vm1412_vm1 = vmand %vm1151_vm4, %vm1284_vm7  ;;  %vm1169_vm13 = vcmp.ge.s32.totalorder %v1038_v48, %v4275_v4  ;;  %vm1302_vm4 = vcmp.lt.s32.totalorder %v1038_v48, %v4284_v8  ;;  %vm1170_vm0 = vcmp.ge.s32.totalorder %v1039_v49, %v4275_v4  ;;  %v1032_v48 = vadd.s32 864, %v4270_v1 }
  0x9f   : > { %vm1413_vm10 = vmand %vm1152_vm5, %vm1285_vm3  ;;  %vm1303_vm5 = vcmp.lt.s32.totalorder %v1039_v49, %v4284_v8  ;;  %v1033_v49 = vadd.s32 872, %v4270_v1 }
  0xa0   : > { %vm3476_vm2 = vmpackc.low %vm1413_vm10, %vm1412_vm1 }
  0xa1   : > { %3771 = vmatpush3.bf16.msk.msra.mxu1 %vm3476_vm2, %v4148_v12  ;;  %vm1398_vm8 = vmand %vm1137_vm12, %vm1270_vm14  ;;  %vm1121_vm12 = vcmp.ge.s32.totalorder %v990_v52, %v4275_v4  ;;  %vm1254_vm14 = vcmp.lt.s32.totalorder %v990_v52, %v4284_v8  ;;  %v1018_v52 = vadd.s32 752, %v4270_v1 }
  0xa2   : > { %vm1399_vm7 = vmand %vm1138_vm6, %vm1271_vm15  ;;  %vm1122_vm6 = vcmp.ge.s32.totalorder %v991_v53, %v4275_v4  ;;  %vm1255_vm15 = vcmp.lt.s32.totalorder %v991_v53, %v4284_v8  ;;  %v1019_v53 = vadd.s32 760, %v4270_v1 }
  0xa3   : > { %vm3430_vm3 = vmpackc.low %vm1399_vm7, %vm1398_vm8  ;;  %vm1153_vm8 = vcmp.ge.s32.totalorder %v1022_v54, %v4275_v4  ;;  %vm1154_vm7 = vcmp.ge.s32.totalorder %v1023_v55, %v4275_v4 }
  0xa4   : > { %3335 = vmatmul.mubr.msk.bf16.gmra.mrb[16].mxu0 %vm4749_vm9, %v4148_v12  ;;  %3708 = vmatprep.subr.msk.bf16.mxu0 %vm3430_vm3, %v4148_v12  ;;  %vm1430_vm1 = vmand %vm1169_vm13, %vm1302_vm4  ;;  %vm1286_vm13 = vcmp.lt.s32.totalorder %v1022_v54, %v4284_v8  ;;  %vm1287_vm3 = vcmp.lt.s32.totalorder %v1023_v55, %v4284_v8  ;;  %v1050_v54 = vadd.s32 1008, %v4270_v1  ;;  %v1051_v55 = vadd.s32 1016, %v4270_v1 }
  0xa5   : > { %3399 = vmatmul.mubr.msk.bf16.gmra.mrb[16].mxu1 %vm4755_vm11, %v4148_v12  ;;  %vm1431_vm10 = vmand %vm1170_vm0, %vm1303_vm5  ;;  %vm573_vm5 = vcmp.eq.s32.totalorder %v4578_v16, %v4467_v50 }
  0xa6   : > { %vm3494_vm2 = vmpackc.low %vm1431_vm10, %vm1430_vm1  ;;  %vm581_vm1 = vcmp.eq.s32.totalorder %v4578_v16, %v4473_v51  ;;  %vm583_vm10 = vcmp.eq.s32.totalorder %v4584_v17, %v4473_v51 }
  0xa7   : > { %3772 = vmatprep.subr.msk.bf16.mxu1 %vm3494_vm2, %v4148_v12  ;;  %vm1382_vm9 = vmand %vm1121_vm12, %vm1254_vm14  ;;  %vm575_vm14 = vcmp.eq.s32.totalorder %v4584_v17, %v4467_v50  ;;  %vm580_vm2 = vcmp.eq.s32.totalorder %v4589_v20, %v4473_v51 }
  0xa8   : > { %vm1383_vm4 = vmand %vm1122_vm6, %vm1255_vm15  ;;  %vm572_vm15 = vcmp.eq.s32.totalorder %v4589_v20, %v4467_v50 }
  0xa9   : > { %vm3414_vm11 = vmpackc.low %vm1383_vm4, %vm1382_vm9 }
  0xaa   : > { %3709 = vmatpush3.bf16.msk.msra.mxu0 %vm3414_vm11, %v4148_v12  ;;  %vm1414_vm0 = vmand %vm1153_vm8, %vm1286_vm13  ;;  %vm574_vm8 = vcmp.eq.s32.totalorder %v4592_v21, %v4467_v50  ;;  %vm582_vm13 = vcmp.eq.s32.totalorder %v4592_v21, %v4473_v51 }
  0xab   : > { %vm1415_vm12 = vmand %vm1154_vm7, %vm1287_vm3  ;;  %vm1139_vm7 = vcmp.ge.s32.totalorder %v1008_v56, %v4275_v4  ;;  %vm1272_vm3 = vcmp.lt.s32.totalorder %v1008_v56, %v4284_v8  ;;  %v1002_v56 = vadd.s32 624, %v4270_v1 }
  0xac   : > { %vm3478_vm6 = vmpackc.low %vm1415_vm12, %vm1414_vm0  ;;  %vm1140_vm0 = vcmp.ge.s32.totalorder %v1009_v57, %v4275_v4 }
  0xad   : > { %3773 = vmatpush3.bf16.msk.msra.mxu1 %vm3478_vm6, %v4148_v12  ;;  %vm3336_vm9 = vmpackc.low %vm581_vm1, %vm573_vm5  ;;  %vm1273_vm5 = vcmp.lt.s32.totalorder %v1009_v57, %v4284_v8  ;;  %v1003_v57 = vadd.s32 632, %v4270_v1 }
  0xae   : > { %3337 = vmatprep.mubr.msk.bf16.mxu0 %vm3336_vm9, %v4148_v12  ;;  %vm3400_vm4 = vmpackc.low %vm583_vm10, %vm575_vm14  ;;  %vm1171_vm14 = vcmp.ge.s32.totalorder %v1040_v60, %v4275_v4  ;;  %vm1304_vm10 = vcmp.lt.s32.totalorder %v1040_v60, %v4284_v8  ;;  %v482_v60 = vsub.s32 5, %v4270_v1 }
  0xaf   : > { %3401 = vmatprep.mubr.msk.bf16.mxu1 %vm3400_vm4, %v4148_v12  ;;  %vm3338_vm11 = vmpackc.low %vm580_vm2, %vm572_vm15  ;;  %vm1172_vm15 = vcmp.ge.s32.totalorder %v1041_v61, %v4275_v4  ;;  %vm1305_vm2 = vcmp.lt.s32.totalorder %v1041_v61, %v4284_v8  ;;  %vm1256_vm4 = vcmp.lt.s32.totalorder %v992_v62, %v4284_v8  ;;  %v1034_v61 = vadd.s32 880, %v4270_v1 }
  0xb0   : > { %3339 = vmatmul.mubr.msk.bf16.gmra.mrb[20].mxu0 %vm3338_vm11, %v4148_v12  ;;  %vm3402_vm1 = vmpackc.low %vm582_vm13, %vm574_vm8  ;;  %vm1123_vm13 = vcmp.ge.s32.totalorder %v992_v62, %v4275_v4  ;;  %vm1257_vm11 = vcmp.lt.s32.totalorder %v993_v63, %v4284_v8  ;;  %v490_v62 = vsub.s32 7, %v4270_v1 }
  0xb1   : > { %3403 = vmatmul.mubr.msk.bf16.gmra.mrb[20].mxu1 %vm3402_vm1, %v4148_v12  ;;  %vm1400_vm12 = vmand %vm1139_vm7, %vm1272_vm3  ;;  %vm1124_vm3 = vcmp.ge.s32.totalorder %v993_v63, %v4275_v4  ;;  %vm1155_vm1 = vcmp.ge.s32.totalorder %v1024_v0, %v4275_v4  ;;  %v1035_v63 = vadd.s32 888, %v4270_v1 }
  0xb2   : > { %vm1401_vm6 = vmand %vm1140_vm0, %vm1273_vm5 }
  0xb3   : > { %vm3432_vm9 = vmpackc.low %vm1401_vm6, %vm1400_vm12  ;;  %vm1288_vm12 = vcmp.lt.s32.totalorder %v1024_v0, %v4284_v8  ;;  %vm1289_vm6 = vcmp.lt.s32.totalorder %v1025_v2, %v4284_v8  ;;  %v478_v0 = vsub.s32 4, %v4270_v1 }
  0xb4   : > { %3710 = vmatprep.subr.msk.bf16.mxu0 %vm3432_vm9, %v4148_v12  ;;  %vm1432_vm8 = vmand %vm1171_vm14, %vm1304_vm10  ;;  %vm1156_vm10 = vcmp.ge.s32.totalorder %v1025_v2, %v4275_v4  ;;  %vm1141_vm9 = vcmp.ge.s32.totalorder %v1010_v6, %v4275_v4  ;;  %v486_v2 = vsub.s32 6, %v4270_v1 }
  0xb5   : > { %vm1433_vm7 = vmand %vm1172_vm15, %vm1305_vm2 }
  0xb6   : > { %vm3496_vm0 = vmpackc.low %vm1433_vm7, %vm1432_vm8  ;;  %vm1274_vm8 = vcmp.lt.s32.totalorder %v1010_v6, %v4284_v8  ;;  %vm1275_vm7 = vcmp.lt.s32.totalorder %v1011_v7, %v4284_v8  ;;  %v5038_v6 = vrot.slane %v4562_v9, %v482_v60 }
  0xb7   : > { %3774 = vmatprep.subr.msk.bf16.mxu1 %vm3496_vm0, %v4148_v12  ;;  %vm1384_vm5 = vmand %vm1123_vm13, %vm1256_vm4  ;;  %vm1142_vm4 = vcmp.ge.s32.totalorder %v1011_v7, %v4275_v4  ;;  %vm1173_vm0 = vcmp.ge.s32.totalorder %v1042_v11, %v4275_v4  ;;  %v5044_v7 = vrot.slane %v4562_v9, %v490_v62 }
  0xb8   : > { %vm1385_vm14 = vmand %vm1124_vm3, %vm1257_vm11 }
  0xb9   : > { %vm3416_vm15 = vmpackc.low %vm1385_vm14, %vm1384_vm5  ;;  %vm1306_vm5 = vcmp.lt.s32.totalorder %v1042_v11, %v4284_v8  ;;  %vm1307_vm14 = vcmp.lt.s32.totalorder %v1043_v13, %v4284_v8  ;;  %v5049_v11 = vrot.slane %v4562_v9, %v478_v0 }
  0xba   : > { %3711 = vmatpush3.bf16.msk.msra.mxu0 %vm3416_vm15, %v4148_v12  ;;  %vm1416_vm2 = vmand %vm1155_vm1, %vm1288_vm12  ;;  %vm1174_vm12 = vcmp.ge.s32.totalorder %v1043_v13, %v4275_v4  ;;  %vm1125_vm15 = vcmp.ge.s32.totalorder %v994_v14, %v4275_v4  ;;  %v5052_v13 = vrot.slane %v4562_v9, %v486_v2 }
  0xbb   : > { %vm1417_vm13 = vmand %vm1156_vm10, %vm1289_vm6 }
  0xbc   : > { %vm3480_vm3 = vmpackc.low %vm1417_vm13, %vm1416_vm2  ;;  %vm1258_vm2 = vcmp.lt.s32.totalorder %v994_v14, %v4284_v8  ;;  %vm1259_vm13 = vcmp.lt.s32.totalorder %v995_v15, %v4284_v8 }
  0xbd   : > { %3775 = vmatpush3.bf16.msk.msra.mxu1 %vm3480_vm3, %v4148_v12  ;;  %vm1402_vm11 = vmand %vm1141_vm9, %vm1274_vm8  ;;  %vm1126_vm8 = vcmp.ge.s32.totalorder %v995_v15, %v4275_v4  ;;  %vm1157_vm3 = vcmp.ge.s32.totalorder %v1026_v22, %v4275_v4 }
  0xbe   : > { %vm1403_vm1 = vmand %vm1142_vm4, %vm1275_vm7 }
  0xbf   : > { %vm3434_vm10 = vmpackc.low %vm1403_vm1, %vm1402_vm11  ;;  %vm1290_vm11 = vcmp.lt.s32.totalorder %v1026_v22, %v4284_v8  ;;  %vm1291_vm1 = vcmp.lt.s32.totalorder %v1027_v23, %v4284_v8 }
  0xc0   : > { %3712 = vmatprep.subr.msk.bf16.mxu0 %vm3434_vm10, %v4148_v12  ;;  %vm1434_vm6 = vmand %vm1173_vm0, %vm1306_vm5  ;;  %vm1158_vm5 = vcmp.ge.s32.totalorder %v1027_v23, %v4275_v4 }
  0xc1   : > { %vm1435_vm9 = vmand %vm1174_vm12, %vm1307_vm14  ;;  %vm589_vm14 = vcmp.eq.s32.totalorder %v4578_v16, %v4504_v58 }
  0xc2   : > { %vm3498_vm4 = vmpackc.low %vm1435_vm9, %vm1434_vm6  ;;  %vm597_vm6 = vcmp.eq.s32.totalorder %v4578_v16, %v4510_v59  ;;  %vm599_vm9 = vcmp.eq.s32.totalorder %v4584_v17, %v4510_v59 }
  0xc3   : > { %3776 = vmatprep.subr.msk.bf16.mxu1 %vm3498_vm4, %v4148_v12  ;;  %vm1386_vm7 = vmand %vm1125_vm15, %vm1258_vm2  ;;  %vm591_vm2 = vcmp.eq.s32.totalorder %v4584_v17, %v4504_v58  ;;  %vm596_vm4 = vcmp.eq.s32.totalorder %v4589_v20, %v4510_v59 }
  0xc4   : > { %vm1387_vm0 = vmand %vm1126_vm8, %vm1259_vm13  ;;  %vm588_vm13 = vcmp.eq.s32.totalorder %v4589_v20, %v4504_v58 }
  0xc5   : > { %vm3418_vm10 = vmpackc.low %vm1387_vm0, %vm1386_vm7 }
  0xc6   : > { %3713 = vmatpush3.bf16.msk.msra.mxu0 %vm3418_vm10, %v4148_v12  ;;  %vm1418_vm12 = vmand %vm1157_vm3, %vm1290_vm11  ;;  %vm590_vm3 = vcmp.eq.s32.totalorder %v4592_v21, %v4504_v58  ;;  %vm598_vm11 = vcmp.eq.s32.totalorder %v4592_v21, %v4510_v59 }
  0xc7   : > { %vm1419_vm15 = vmand %vm1158_vm5, %vm1291_vm1  ;;  %vm1143_vm5 = vcmp.ge.s32.totalorder %v1012_v24, %v4275_v4  ;;  %vm1276_vm1 = vcmp.lt.s32.totalorder %v1012_v24, %v4284_v8 }
  0xc8   : > { %vm3482_vm8 = vmpackc.low %vm1419_vm15, %vm1418_vm12  ;;  %vm1144_vm12 = vcmp.ge.s32.totalorder %v1013_v25, %v4275_v4 }
  0xc9   : > { %3777 = vmatpush3.bf16.msk.msra.mxu1 %vm3482_vm8, %v4148_v12  ;;  %vm3340_vm7 = vmpackc.low %vm597_vm6, %vm589_vm14  ;;  %vm1277_vm14 = vcmp.lt.s32.totalorder %v1013_v25, %v4284_v8 }
  0xca   : > { %3341 = vmatprep.mubr.msk.bf16.mxu0 %vm3340_vm7, %v4148_v12  ;;  %vm3404_vm0 = vmpackc.low %vm599_vm9, %vm591_vm2  ;;  %vm1175_vm2 = vcmp.ge.s32.totalorder %v1044_v28, %v4275_v4  ;;  %vm1308_vm9 = vcmp.lt.s32.totalorder %v1044_v28, %v4284_v8 }
  0xcb   : > { %3405 = vmatprep.mubr.msk.bf16.mxu1 %vm3404_vm0, %v4148_v12  ;;  %vm3342_vm10 = vmpackc.low %vm596_vm4, %vm588_vm13  ;;  %vm1176_vm13 = vcmp.ge.s32.totalorder %v1045_v29, %v4275_v4  ;;  %vm1309_vm4 = vcmp.lt.s32.totalorder %v1045_v29, %v4284_v8  ;;  %vm1260_vm0 = vcmp.lt.s32.totalorder %v996_v30, %v4284_v8 }
  0xcc   : > { %3343 = vmatmul.mubr.msk.bf16.gmra.mrb[24].mxu0 %vm3342_vm10, %v4148_v12  ;;  %vm3406_vm6 = vmpackc.low %vm598_vm11, %vm590_vm3  ;;  %vm1127_vm11 = vcmp.ge.s32.totalorder %v996_v30, %v4275_v4  ;;  %vm1261_vm10 = vcmp.lt.s32.totalorder %v997_v31, %v4284_v8 }
  0xcd   : > { %3407 = vmatmul.mubr.msk.bf16.gmra.mrb[24].mxu1 %vm3406_vm6, %v4148_v12  ;;  %vm1404_vm15 = vmand %vm1143_vm5, %vm1276_vm1  ;;  %vm1128_vm1 = vcmp.ge.s32.totalorder %v997_v31, %v4275_v4  ;;  %vm1159_vm6 = vcmp.ge.s32.totalorder %v1028_v32, %v4275_v4 }
  0xce   : > { %vm1405_vm8 = vmand %vm1144_vm12, %vm1277_vm14 }
  0xcf   : > { %vm3436_vm7 = vmpackc.low %vm1405_vm8, %vm1404_vm15  ;;  %vm1292_vm15 = vcmp.lt.s32.totalorder %v1028_v32, %v4284_v8  ;;  %vm1293_vm8 = vcmp.lt.s32.totalorder %v1029_v33, %v4284_v8 }
  0xd0   : > { %3714 = vmatprep.subr.msk.bf16.mxu0 %vm3436_vm7, %v4148_v12  ;;  %vm1436_vm3 = vmand %vm1175_vm2, %vm1308_vm9  ;;  %vm1160_vm9 = vcmp.ge.s32.totalorder %v1029_v33, %v4275_v4  ;;  %vm1145_vm7 = vcmp.ge.s32.totalorder %v1014_v36, %v4275_v4 }
  0xd1   : > { %vm1437_vm5 = vmand %vm1176_vm13, %vm1309_vm4 }
  0xd2   : > { %vm3500_vm12 = vmpackc.low %vm1437_vm5, %vm1436_vm3  ;;  %vm1278_vm3 = vcmp.lt.s32.totalorder %v1014_v36, %v4284_v8  ;;  %vm1279_vm5 = vcmp.lt.s32.totalorder %v1015_v37, %v4284_v8 }
  0xd3   : > { %3778 = vmatprep.subr.msk.bf16.mxu1 %vm3500_vm12, %v4148_v12  ;;  %vm1388_vm14 = vmand %vm1127_vm11, %vm1260_vm0  ;;  %vm1146_vm0 = vcmp.ge.s32.totalorder %v1015_v37, %v4275_v4  ;;  %vm1177_vm12 = vcmp.ge.s32.totalorder %v1046_v38, %v4275_v4 }
  0xd4   : > { %vm1389_vm2 = vmand %vm1128_vm1, %vm1261_vm10 }
  0xd5   : > { %vm3420_vm13 = vmpackc.low %vm1389_vm2, %vm1388_vm14  ;;  %vm1310_vm14 = vcmp.lt.s32.totalorder %v1046_v38, %v4284_v8  ;;  %vm1311_vm2 = vcmp.lt.s32.totalorder %v1047_v39, %v4284_v8 }
  0xd6   : > { %3715 = vmatpush3.bf16.msk.msra.mxu0 %vm3420_vm13, %v4148_v12  ;;  %vm1420_vm4 = vmand %vm1159_vm6, %vm1292_vm15  ;;  %vm1178_vm15 = vcmp.ge.s32.totalorder %v1047_v39, %v4275_v4  ;;  %vm1129_vm13 = vcmp.ge.s32.totalorder %v998_v40, %v4275_v4 }
  0xd7   : > { %vm1421_vm11 = vmand %vm1160_vm9, %vm1293_vm8 }
  0xd8   : > { %vm3484_vm1 = vmpackc.low %vm1421_vm11, %vm1420_vm4  ;;  %vm1262_vm4 = vcmp.lt.s32.totalorder %v998_v40, %v4284_v8  ;;  %vm1263_vm11 = vcmp.lt.s32.totalorder %v999_v41, %v4284_v8 }
  0xd9   : > { %3779 = vmatpush3.bf16.msk.msra.mxu1 %vm3484_vm1, %v4148_v12  ;;  %vm1406_vm10 = vmand %vm1145_vm7, %vm1278_vm3  ;;  %vm1130_vm3 = vcmp.ge.s32.totalorder %v999_v41, %v4275_v4  ;;  %vm1161_vm1 = vcmp.ge.s32.totalorder %v1030_v44, %v4275_v4 }
  0xda   : > { %vm1407_vm6 = vmand %vm1146_vm0, %vm1279_vm5 }
  0xdb   : > { %vm3438_vm9 = vmpackc.low %vm1407_vm6, %vm1406_vm10  ;;  %vm1294_vm10 = vcmp.lt.s32.totalorder %v1030_v44, %v4284_v8  ;;  %vm1295_vm6 = vcmp.lt.s32.totalorder %v1031_v45, %v4284_v8 }
  0xdc   : > { %3716 = vmatprep.subr.msk.bf16.mxu0 %vm3438_vm9, %v4148_v12  ;;  %vm1438_vm8 = vmand %vm1177_vm12, %vm1310_vm14  ;;  %vm1162_vm14 = vcmp.ge.s32.totalorder %v1031_v45, %v4275_v4 }
  0xdd   : > { %vm1439_vm7 = vmand %vm1178_vm15, %vm1311_vm2  ;;  %vm605_vm2 = vcmp.eq.s32.totalorder %v4578_v16, %v4547_v3 }
  0xde   : > { %vm3502_vm0 = vmpackc.low %vm1439_vm7, %vm1438_vm8  ;;  %vm613_vm8 = vcmp.eq.s32.totalorder %v4578_v16, %v4556_v5  ;;  %vm615_vm7 = vcmp.eq.s32.totalorder %v4584_v17, %v4556_v5  ;;  %v1048_v16 = vadd.s32 992, %v4270_v1 }
  0xdf   : > { %3780 = vmatprep.subr.msk.bf16.mxu1 %vm3502_vm0, %v4148_v12  ;;  %vm1390_vm5 = vmand %vm1129_vm13, %vm1262_vm4  ;;  %vm607_vm4 = vcmp.eq.s32.totalorder %v4584_v17, %v4547_v3  ;;  %vm612_vm0 = vcmp.eq.s32.totalorder %v4589_v20, %v4556_v5  ;;  %v1049_v17 = vadd.s32 1000, %v4270_v1 }
  0xe0   : > { %vm1391_vm12 = vmand %vm1130_vm3, %vm1263_vm11  ;;  %vm604_vm11 = vcmp.eq.s32.totalorder %v4589_v20, %v4547_v3  ;;  %v1000_v20 = vadd.s32 608, %v4270_v1 }
  0xe1   : > { %vm3422_vm9 = vmpackc.low %vm1391_vm12, %vm1390_vm5 }
  0xe2   : > { %3717 = vmatpush3.bf16.msk.msra.mxu0 %vm3422_vm9, %v4148_v12  ;;  %vm1422_vm15 = vmand %vm1161_vm1, %vm1294_vm10  ;;  %vm606_vm1 = vcmp.eq.s32.totalorder %v4592_v21, %v4547_v3  ;;  %vm614_vm10 = vcmp.eq.s32.totalorder %v4592_v21, %v4556_v5  ;;  %v1001_v21 = vadd.s32 616, %v4270_v1 }
  0xe3   : > { %vm1423_vm13 = vmand %vm1162_vm14, %vm1295_vm6  ;;  %vm1147_vm14 = vcmp.ge.s32.totalorder %v1016_v46, %v4275_v4  ;;  %vm1280_vm6 = vcmp.lt.s32.totalorder %v1016_v46, %v4284_v8 }
  0xe4   : > { %vm3486_vm3 = vmpackc.low %vm1423_vm13, %vm1422_vm15  ;;  %vm1148_vm15 = vcmp.ge.s32.totalorder %v1017_v47, %v4275_v4 }
  0xe5   : > { %3781 = vmatpush3.bf16.msk.msra.mxu1 %vm3486_vm3, %v4148_v12  ;;  %vm3344_vm5 = vmpackc.low %vm613_vm8, %vm605_vm2  ;;  %vm1281_vm2 = vcmp.lt.s32.totalorder %v1017_v47, %v4284_v8 }
  0xe6   : > { %3345 = vmatprep.mubr.msk.bf16.mxu0 %vm3344_vm5, %v4148_v12  ;;  %vm3408_vm12 = vmpackc.low %vm615_vm7, %vm607_vm4  ;;  %vm1179_vm4 = vcmp.ge.s32.totalorder %v1048_v16, %v4275_v4  ;;  %vm1312_vm7 = vcmp.lt.s32.totalorder %v1048_v16, %v4284_v8 }
  0xe7   : > { %3409 = vmatprep.mubr.msk.bf16.mxu1 %vm3408_vm12, %v4148_v12  ;;  %vm3346_vm9 = vmpackc.low %vm612_vm0, %vm604_vm11  ;;  %vm1180_vm11 = vcmp.ge.s32.totalorder %v1049_v17, %v4275_v4  ;;  %vm1313_vm0 = vcmp.lt.s32.totalorder %v1049_v17, %v4284_v8  ;;  %vm1264_vm12 = vcmp.lt.s32.totalorder %v1000_v20, %v4284_v8 }
  0xe8   : > { %3347 = vmatmul.mubr.msk.bf16.gmra.mrb[28].mxu0 %vm3346_vm9, %v4148_v12  ;;  %vm3410_vm8 = vmpackc.low %vm614_vm10, %vm606_vm1  ;;  %vm1131_vm10 = vcmp.ge.s32.totalorder %v1000_v20, %v4275_v4  ;;  %vm1265_vm9 = vcmp.lt.s32.totalorder %v1001_v21, %v4284_v8 }
  0xe9   : > { %3411 = vmatmul.mubr.msk.bf16.gmra.mrb[28].mxu1 %vm3410_vm8, %v4148_v12  ;;  %vm1408_vm13 = vmand %vm1147_vm14, %vm1280_vm6  ;;  %vm1132_vm6 = vcmp.ge.s32.totalorder %v1001_v21, %v4275_v4  ;;  %vm1163_vm8 = vcmp.ge.s32.totalorder %v1032_v48, %v4275_v4 }
  0xea   : > { %vm1409_vm3 = vmand %vm1148_vm15, %vm1281_vm2 }
  0xeb   : > { %vm3440_vm5 = vmpackc.low %vm1409_vm3, %vm1408_vm13  ;;  %vm1296_vm13 = vcmp.lt.s32.totalorder %v1032_v48, %v4284_v8  ;;  %vm1297_vm3 = vcmp.lt.s32.totalorder %v1033_v49, %v4284_v8 }
  0xec   : > { %3718 = vmatprep.subr.msk.bf16.mxu0 %vm3440_vm5, %v4148_v12  ;;  %vm1440_vm1 = vmand %vm1179_vm4, %vm1312_vm7  ;;  %vm1164_vm7 = vcmp.ge.s32.totalorder %v1033_v49, %v4275_v4  ;;  %vm1149_vm5 = vcmp.ge.s32.totalorder %v1018_v52, %v4275_v4 }
  0xed   : > { %vm1441_vm14 = vmand %vm1180_vm11, %vm1313_vm0 }
  0xee   : > { %vm3504_vm15 = vmpackc.low %vm1441_vm14, %vm1440_vm1  ;;  %vm1282_vm1 = vcmp.lt.s32.totalorder %v1018_v52, %v4284_v8  ;;  %vm1283_vm14 = vcmp.lt.s32.totalorder %v1019_v53, %v4284_v8 }
  0xef   : > { %3782 = vmatprep.subr.msk.bf16.mxu1 %vm3504_vm15, %v4148_v12  ;;  %vm1392_vm2 = vmand %vm1131_vm10, %vm1264_vm12  ;;  %vm1150_vm12 = vcmp.ge.s32.totalorder %v1019_v53, %v4275_v4  ;;  %vm1181_vm15 = vcmp.ge.s32.totalorder %v1050_v54, %v4275_v4 }
  0xf0   : > { %vm1393_vm4 = vmand %vm1132_vm6, %vm1265_vm9 }
  0xf1   : > { %vm3424_vm11 = vmpackc.low %vm1393_vm4, %vm1392_vm2  ;;  %vm1314_vm2 = vcmp.lt.s32.totalorder %v1050_v54, %v4284_v8  ;;  %vm1315_vm4 = vcmp.lt.s32.totalorder %v1051_v55, %v4284_v8 }
  0xf2   : > { %3719 = vmatpush3.bf16.msk.msra.mxu0 %vm3424_vm11, %v4148_v12  ;;  %vm1424_vm0 = vmand %vm1163_vm8, %vm1296_vm13  ;;  %vm1182_vm13 = vcmp.ge.s32.totalorder %v1051_v55, %v4275_v4  ;;  %vm1133_vm11 = vcmp.ge.s32.totalorder %v1002_v56, %v4275_v4 }
  0xf3   : > { %vm1425_vm10 = vmand %vm1164_vm7, %vm1297_vm3 }
  0xf4   : > { %vm3488_vm6 = vmpackc.low %vm1425_vm10, %vm1424_vm0  ;;  %vm1266_vm0 = vcmp.lt.s32.totalorder %v1002_v56, %v4284_v8  ;;  %vm1267_vm10 = vcmp.lt.s32.totalorder %v1003_v57, %v4284_v8 }
  0xf5   : > { %3783 = vmatpush3.bf16.msk.msra.mxu1 %vm3488_vm6, %v4148_v12  ;;  %vm1410_vm9 = vmand %vm1149_vm5, %vm1282_vm1  ;;  %vm1134_vm1 = vcmp.ge.s32.totalorder %v1003_v57, %v4275_v4  ;;  %vm1165_vm6 = vcmp.ge.s32.totalorder %v1034_v61, %v4275_v4 }
  0xf6   : > { %vm1411_vm8 = vmand %vm1150_vm12, %vm1283_vm14 }
  0xf7   : > { %vm3442_vm7 = vmpackc.low %vm1411_vm8, %vm1410_vm9  ;;  %vm1298_vm9 = vcmp.lt.s32.totalorder %v1034_v61, %v4284_v8  ;;  %vm1299_vm8 = vcmp.lt.s32.totalorder %v1035_v63, %v4284_v8 }
  0xf8   : > { %3720 = vmatprep.subr.msk.bf16.mxu0 %vm3442_vm7, %v4148_v12  ;;  %vm1442_vm3 = vmand %vm1181_vm15, %vm1314_vm2  ;;  %vm1166_vm2 = vcmp.ge.s32.totalorder %v1035_v63, %v4275_v4  ;;  %vm497_vm7 = vcmp.eq.s32.totalorder %v5038_v6, %v4270_v1 }
  0xf9   : > { %vm1443_vm5 = vmand %vm1182_vm13, %vm1315_vm4 }
  0xfa   : > { %vm3506_vm12 = vmpackc.low %vm1443_vm5, %vm1442_vm3  ;;  %vm505_vm3 = vcmp.eq.s32.totalorder %v5038_v6, %v4293_v10  ;;  %vm507_vm5 = vcmp.eq.s32.totalorder %v5044_v7, %v4293_v10 }
  0xfb   : > { %3784 = vmatprep.subr.msk.bf16.mxu1 %vm3506_vm12, %v4148_v12  ;;  %vm1394_vm14 = vmand %vm1133_vm11, %vm1266_vm0  ;;  %vm499_vm0 = vcmp.eq.s32.totalorder %v5044_v7, %v4270_v1  ;;  %vm504_vm12 = vcmp.eq.s32.totalorder %v5049_v11, %v4293_v10 }
  0xfc   : > { %vm1395_vm15 = vmand %vm1134_vm1, %vm1267_vm10  ;;  %vm496_vm10 = vcmp.eq.s32.totalorder %v5049_v11, %v4270_v1 }
  0xfd   : > { %vm3426_vm13 = vmpackc.low %vm1395_vm15, %vm1394_vm14 }
  0xfe   : > { %3721 = vmatpush3.bf16.msk.msra.mxu0 %vm3426_vm13, %v4148_v12  ;;  %vm1426_vm4 = vmand %vm1165_vm6, %vm1298_vm9  ;;  %vm498_vm6 = vcmp.eq.s32.totalorder %v5052_v13, %v4270_v1  ;;  %vm506_vm9 = vcmp.eq.s32.totalorder %v5052_v13, %v4293_v10 }
  0xff   : > { %vm1427_vm11 = vmand %vm1166_vm2, %vm1299_vm8  ;;  %vm513_vm2 = vcmp.eq.s32.totalorder %v5038_v6, %v4323_v18  ;;  %vm521_vm8 = vcmp.eq.s32.totalorder %v5038_v6, %v4329_v19 }
 0x100   : > { %vm3490_vm1 = vmpackc.low %vm1427_vm11, %vm1426_vm4  ;;  %vm515_vm4 = vcmp.eq.s32.totalorder %v5044_v7, %v4323_v18 }
 0x101   : > { %3785 = vmatpush3.bf16.msk.msra.mxu1 %vm3490_vm1, %v4148_v12  ;;  %vm3444_vm14 = vmpackc.low %vm505_vm3, %vm497_vm7  ;;  %vm523_vm7 = vcmp.eq.s32.totalorder %v5044_v7, %v4329_v19 }
 0x102   : > { %3445 = vmatprep.mubr.msk.bf16.mxu0 %vm3444_vm14, %v4148_v12  ;;  %vm3508_vm15 = vmpackc.low %vm507_vm5, %vm499_vm0  ;;  %vm512_vm0 = vcmp.eq.s32.totalorder %v5049_v11, %v4323_v18  ;;  %vm520_vm5 = vcmp.eq.s32.totalorder %v5049_v11, %v4329_v19  ;;  %vm529_vm14 = vcmp.eq.s32.totalorder %v5038_v6, %v4359_v26 }
 0x103   : > { %3509 = vmatprep.mubr.msk.bf16.mxu1 %vm3508_vm15, %v4148_v12  ;;  %vm3446_vm13 = vmpackc.low %vm504_vm12, %vm496_vm10  ;;  %vm514_vm10 = vcmp.eq.s32.totalorder %v5052_v13, %v4323_v18  ;;  %vm522_vm12 = vcmp.eq.s32.totalorder %v5052_v13, %v4329_v19  ;;  %vm531_vm15 = vcmp.eq.s32.totalorder %v5044_v7, %v4359_v26 }
 0x104   : > { %3447 = vmatmul.mubr.msk.bf16.vlgmr.msra.gmra.mrb[32].mxu0 %vm3446_vm13, %v4148_v12  ;;  %vm3510_vm3 = vmpackc.low %vm506_vm9, %vm498_vm6  ;;  %vm537_vm6 = vcmp.eq.s32.totalorder %v5038_v6, %v4365_v27 }
 0x105   : > { %3511 = vmatmul.mubr.msk.bf16.vlgmr.msra.gmra.mrb[32].mxu1 %vm3510_vm3, %v4148_v12  ;;  %vm3448_vm11 = vmpackc.low %vm521_vm8, %vm513_vm2  ;;  %vm539_vm2 = vcmp.eq.s32.totalorder %v5044_v7, %v4365_v27  ;;  %vm536_vm3 = vcmp.eq.s32.totalorder %v5049_v11, %v4365_v27 }
 0x106   : > { %3449 = vmatprep.mubr.msk.bf16.mxu0 %vm3448_vm11, %v4148_v12  ;;  %vm3512_vm1 = vmpackc.low %vm523_vm7, %vm515_vm4  ;;  %vm528_vm7 = vcmp.eq.s32.totalorder %v5049_v11, %v4359_v26  ;;  %vm530_vm11 = vcmp.eq.s32.totalorder %v5052_v13, %v4359_v26 }
 0x107   : > { %3513 = vmatprep.mubr.msk.bf16.mxu1 %vm3512_vm1, %v4148_v12  ;;  %vm3450_vm9 = vmpackc.low %vm520_vm5, %vm512_vm0  ;;  %vm538_vm0 = vcmp.eq.s32.totalorder %v5052_v13, %v4365_v27  ;;  %vm545_vm5 = vcmp.eq.s32.totalorder %v5038_v6, %v4395_v34  ;;  %vm553_vm1 = vcmp.eq.s32.totalorder %v5038_v6, %v4401_v35 }
 0x108   : > { %vm3514_vm8 = vmpackc.low %vm522_vm12, %vm514_vm10  ;;  %vm547_vm12 = vcmp.eq.s32.totalorder %v5044_v7, %v4395_v34 }
 0x109   : > { %vm3452_vm13 = vmpackc.low %vm537_vm6, %vm529_vm14  ;;  %vm555_vm14 = vcmp.eq.s32.totalorder %v5044_v7, %v4401_v35 }
 0x10a   : > { %vm3516_vm4 = vmpackc.low %vm539_vm2, %vm531_vm15  ;;  %vm544_vm2 = vcmp.eq.s32.totalorder %v5049_v11, %v4395_v34 }
 0x10b   : > { %vm3454_vm10 = vmpackc.low %vm536_vm3, %vm528_vm7  ;;  %vm561_vm7 = vcmp.eq.s32.totalorder %v5038_v6, %v4431_v42  ;;  %vm569_vm3 = vcmp.eq.s32.totalorder %v5038_v6, %v4437_v43 }
 0x10c   : > { %3451 = vmatmul.mubr.msk.bf16.gmra.mrb[36].mxu0 %vm3450_vm9, %v4148_v12  ;;  %vm3518_vm6 = vmpackc.low %vm538_vm0, %vm530_vm11  ;;  %vm563_vm0 = vcmp.eq.s32.totalorder %v5044_v7, %v4431_v42 }
 0x10d   : > { %3515 = vmatmul.mubr.msk.bf16.gmra.mrb[36].mxu1 %vm3514_vm8, %v4148_v12  ;;  %3453 = vmatprep.mubr.msk.bf16.mxu0 %vm3452_vm13, %v4148_v12  ;;  %vm3456_vm9 = vmpackc.low %vm553_vm1, %vm545_vm5  ;;  %vm552_vm8 = vcmp.eq.s32.totalorder %v5049_v11, %v4401_v35  ;;  %vm546_vm13 = vcmp.eq.s32.totalorder %v5052_v13, %v4395_v34  ;;  %vm571_vm5 = vcmp.eq.s32.totalorder %v5044_v7, %v4437_v43 }
 0x10e   : > { %3517 = vmatprep.mubr.msk.bf16.mxu1 %vm3516_vm4, %v4148_v12  ;;  %vm3520_vm15 = vmpackc.low %vm555_vm14, %vm547_vm12  ;;  %vm554_vm4 = vcmp.eq.s32.totalorder %v5052_v13, %v4401_v35  ;;  %vm560_vm14 = vcmp.eq.s32.totalorder %v5049_v11, %v4431_v42 }
 0x10f   : > { %vm3458_vm11 = vmpackc.low %vm552_vm8, %vm544_vm2  ;;  %vm577_vm2 = vcmp.eq.s32.totalorder %v5038_v6, %v4467_v50  ;;  %vm585_vm8 = vcmp.eq.s32.totalorder %v5038_v6, %v4473_v51 }
 0x110   : > { %vm3522_vm1 = vmpackc.low %vm554_vm4, %vm546_vm13  ;;  %vm579_vm4 = vcmp.eq.s32.totalorder %v5044_v7, %v4467_v50 }
 0x111   : > { %vm3524_vm12 = vmpackc.low %vm571_vm5, %vm563_vm0  ;;  %vm576_vm5 = vcmp.eq.s32.totalorder %v5049_v11, %v4467_v50 }
 0x114   : > { %3455 = vmatmul.mubr.msk.bf16.gmra.mrb[40].mxu0 %vm3454_vm10, %v4148_v12  ;;  %vm3460_vm10 = vmpackc.low %vm569_vm3, %vm561_vm7  ;;  %vm587_vm7 = vcmp.eq.s32.totalorder %v5044_v7, %v4473_v51 }
 0x115   : > { %3519 = vmatmul.mubr.msk.bf16.gmra.mrb[40].mxu1 %vm3518_vm6, %v4148_v12  ;;  %3457 = vmatprep.mubr.msk.bf16.mxu0 %vm3456_vm9, %v4148_v12  ;;  %vm568_vm6 = vcmp.eq.s32.totalorder %v5049_v11, %v4437_v43  ;;  %vm562_vm9 = vcmp.eq.s32.totalorder %v5052_v13, %v4431_v42  ;;  %vm3528_vm0 = vmpackc.low %vm587_vm7, %vm579_vm4  ;;  %vm592_vm7 = vcmp.eq.s32.totalorder %v5049_v11, %v4504_v58 }
 0x116   : > { %3521 = vmatprep.mubr.msk.bf16.mxu1 %vm3520_vm15, %v4148_v12  ;;  %vm570_vm15 = vcmp.eq.s32.totalorder %v5052_v13, %v4437_v43  ;;  %vm3462_vm13 = vmpackc.low %vm568_vm6, %vm560_vm14  ;;  %vm593_vm14 = vcmp.eq.s32.totalorder %v5038_v6, %v4504_v58  ;;  %vm601_vm6 = vcmp.eq.s32.totalorder %v5038_v6, %v4510_v59 }
 0x117   : > { %vm3526_vm3 = vmpackc.low %vm570_vm15, %vm562_vm9  ;;  %vm595_vm15 = vcmp.eq.s32.totalorder %v5044_v7, %v4504_v58 }
 0x11c   : > { %3459 = vmatmul.mubr.msk.bf16.gmra.mrb[44].mxu0 %vm3458_vm11, %v4148_v12  ;;  %vm3464_vm11 = vmpackc.low %vm585_vm8, %vm577_vm2  ;;  %vm603_vm2 = vcmp.eq.s32.totalorder %v5044_v7, %v4510_v59 }
 0x11d   : > { %3523 = vmatmul.mubr.msk.bf16.gmra.mrb[44].mxu1 %vm3522_vm1, %v4148_v12  ;;  %3461 = vmatprep.mubr.msk.bf16.mxu0 %vm3460_vm10, %v4148_v12  ;;  %vm584_vm1 = vcmp.eq.s32.totalorder %v5049_v11, %v4473_v51  ;;  %vm578_vm10 = vcmp.eq.s32.totalorder %v5052_v13, %v4467_v50  ;;  %vm3532_vm4 = vmpackc.low %vm603_vm2, %vm595_vm15  ;;  %vm608_vm2 = vcmp.eq.s32.totalorder %v5049_v11, %v4547_v3 }
 0x11e   : > { %3525 = vmatprep.mubr.msk.bf16.mxu1 %vm3524_vm12, %v4148_v12  ;;  %vm586_vm12 = vcmp.eq.s32.totalorder %v5052_v13, %v4473_v51  ;;  %vm3466_vm9 = vmpackc.low %vm584_vm1, %vm576_vm5  ;;  %vm609_vm5 = vcmp.eq.s32.totalorder %v5038_v6, %v4547_v3  ;;  %vm617_vm1 = vcmp.eq.s32.totalorder %v5038_v6, %v4556_v5 }
 0x11f   : > { %vm3530_vm8 = vmpackc.low %vm586_vm12, %vm578_vm10  ;;  %vm611_vm12 = vcmp.eq.s32.totalorder %v5044_v7, %v4547_v3 }
 0x124   : > { %3463 = vmatmul.mubr.msk.bf16.gmra.mrb[48].mxu0 %vm3462_vm13, %v4148_v12  ;;  %vm3468_vm13 = vmpackc.low %vm601_vm6, %vm593_vm14  ;;  %vm619_vm14 = vcmp.eq.s32.totalorder %v5044_v7, %v4556_v5 }
 0x125   : > { %3527 = vmatmul.mubr.msk.bf16.gmra.mrb[48].mxu1 %vm3526_vm3, %v4148_v12  ;;  %3465 = vmatprep.mubr.msk.bf16.mxu0 %vm3464_vm11, %v4148_v12  ;;  %vm600_vm3 = vcmp.eq.s32.totalorder %v5049_v11, %v4510_v59  ;;  %vm594_vm11 = vcmp.eq.s32.totalorder %v5052_v13, %v4504_v58  ;;  %vm3536_vm15 = vmpackc.low %vm619_vm14, %vm611_vm12 }
 0x126   : > { %3529 = vmatprep.mubr.msk.bf16.mxu1 %vm3528_vm0, %v4148_v12  ;;  %vm602_vm0 = vcmp.eq.s32.totalorder %v5052_v13, %v4510_v59  ;;  %vm3470_vm10 = vmpackc.low %vm600_vm3, %vm592_vm7 }
 0x127   : > { %vm3534_vm6 = vmpackc.low %vm602_vm0, %vm594_vm11  ;;  %vm2405_vm11 = vcmask 523264  }
 0x12c   : > { %3467 = vmatmul.mubr.msk.bf16.gmra.mrb[52].mxu0 %vm3466_vm9, %v4148_v12  ;;  %vm3472_vm9 = vmpackc.low %vm617_vm1, %vm609_vm5 }
 0x12d   : > { %3531 = vmatmul.mubr.msk.bf16.gmra.mrb[52].mxu1 %vm3530_vm8, %v4148_v12  ;;  %3469 = vmatprep.mubr.msk.bf16.mxu0 %vm3468_vm13, %v4148_v12  ;;  %vm616_vm8 = vcmp.eq.s32.totalorder %v5049_v11, %v4556_v5  ;;  %vm610_vm13 = vcmp.eq.s32.totalorder %v5052_v13, %v4547_v3 }
 0x12e   : > { %3533 = vmatprep.mubr.msk.bf16.mxu1 %vm3532_vm4, %v4148_v12  ;;  %vm618_vm4 = vcmp.eq.s32.totalorder %v5052_v13, %v4556_v5  ;;  %vm3474_vm7 = vmpackc.low %vm616_vm8, %vm608_vm2 }
 0x12f   : > { %vm3538_vm3 = vmpackc.low %vm618_vm4, %vm610_vm13 }
 0x134   : > { %3471 = vmatmul.mubr.msk.bf16.gmra.mrb[56].mxu0 %vm3470_vm10, %v4148_v12 }
 0x135   : > { %3535 = vmatmul.mubr.msk.bf16.gmra.mrb[56].mxu1 %vm3534_vm6, %v4148_v12  ;;  %3473 = vmatprep.mubr.msk.bf16.mxu0 %vm3472_vm9, %v4148_v12 }
 0x136   : > { %3537 = vmatprep.mubr.msk.bf16.mxu1 %vm3536_vm15, %v4148_v12 }
 0x13c   : > { %3475 = vmatmul.mubr.msk.bf16.gmra.mrb[60].mxu0 %vm3474_vm7, %v4148_v12 }
 0x13d   : > { %3539 = vmatmul.mubr.msk.bf16.gmra.mrb[60].mxu1 %vm3538_vm3, %v4148_v12 }
 0x157   : > { %v3594_v1 = vpop.f32.mrb[0].mxu0 }
 0x158   : > { %v3658_v4 = vpop.f32.mrb[0].mxu1  ;;  %v3595_v8 = vpop.f32.mrb[1].mxu0 }
 0x159   : > { %v3596_v10 = vadd.f32 %v3595_v8, %v3594_v1  ;;  %v3659_v18 = vpop.f32.mrb[1].mxu1  ;;  %v3597_v19 = vpop.f32.mrb[2].mxu0 }
 0x15a   : > { %v3660_v26 = vadd.f32 %v3659_v18, %v3658_v4  ;;  %v3661_v27 = vpop.f32.mrb[2].mxu1  ;;  %v3598_v34 = vpop.f32.mrb[3].mxu0 }
 0x15b   : > { %v3599_v35 = vadd.f32 %v3598_v34, %v3597_v19  ;;  %v3662_v42 = vpop.f32.mrb[3].mxu1 }
 0x15c   : > { %v5216_v43 = vadd.f32 %v3660_v26, %v3596_v10  ;;  %v3663_v50 = vadd.f32 %v3662_v42, %v3661_v27 }
 0x15e   : > { %v5218_v51 = vadd.f32 %v3663_v50, %v3599_v35 }
 0x15f   : > { %v3600_v58 = vpop.f32.mrb[4].mxu0 }
 0x160   : > { %v3664_v59 = vpop.f32.mrb[4].mxu1  ;;  %v3601_v3 = vpop.f32.mrb[5].mxu0 }
 0x161   : > { %v3602_v12 = vadd.f32 %v3601_v3, %v3600_v58  ;;  %v3665_v5 = vpop.f32.mrb[5].mxu1  ;;  %v3603_v9 = vpop.f32.mrb[6].mxu0 }
 0x162   : > { %v3666_v14 = vadd.f32 %v3665_v5, %v3664_v59  ;;  %v3667_v15 = vpop.f32.mrb[6].mxu1  ;;  %v3604_v22 = vpop.f32.mrb[7].mxu0 }
 0x163   : > { %v3605_v23 = vadd.f32 %v3604_v22, %v3603_v9  ;;  %v3668_v24 = vpop.f32.mrb[7].mxu1  ;;  %v4032_v22 = vld [vmem:[%s5244_s17] sm:$0xff]  }
 0x164   : > { %v5220_v25 = vadd.f32 %v3666_v14, %v3602_v12  ;;  %v3669_v28 = vadd.f32 %v3668_v24, %v3667_v15  ;;  %3890 = vmatprep.mubr.bf16.mxu1 %v4032_v22 }
 0x166   : > { %v5222_v29 = vadd.f32 %v3669_v28, %v3605_v23 }
 0x167   : > { %v3606_v30 = vpop.f32.mrb[8].mxu0 }
 0x168   : > { %v3670_v31 = vpop.f32.mrb[8].mxu1  ;;  %v3607_v32 = vpop.f32.mrb[9].mxu0 }
 0x169   : > { %v3608_v33 = vadd.f32 %v3607_v32, %v3606_v30  ;;  %v3671_v36 = vpop.f32.mrb[9].mxu1  ;;  %v3609_v37 = vpop.f32.mrb[10].mxu0 }
 0x16a   : > { %v3672_v38 = vadd.f32 %v3671_v36, %v3670_v31  ;;  %v3673_v39 = vpop.f32.mrb[10].mxu1  ;;  %v3610_v40 = vpop.f32.mrb[11].mxu0 }
 0x16b   : > { %v3611_v41 = vadd.f32 %v3610_v40, %v3609_v37  ;;  %v3674_v44 = vpop.f32.mrb[11].mxu1 }
 0x16c   : > { %v5224_v45 = vadd.f32 %v3672_v38, %v3608_v33  ;;  %v3675_v46 = vadd.f32 %v3674_v44, %v3673_v39 }
 0x16e   : > { %v5226_v47 = vadd.f32 %v3675_v46, %v3611_v41 }
 0x16f   : > { %v3612_v16 = vpop.f32.mrb[12].mxu0 }
 0x170   : > { %v3676_v17 = vpop.f32.mrb[12].mxu1  ;;  %v3613_v20 = vpop.f32.mrb[13].mxu0 }
 0x171   : > { %v3614_v21 = vadd.f32 %v3613_v20, %v3612_v16  ;;  %v3677_v48 = vpop.f32.mrb[13].mxu1  ;;  %v3615_v49 = vpop.f32.mrb[14].mxu0 }
 0x172   : > { %v3678_v52 = vadd.f32 %v3677_v48, %v3676_v17  ;;  %v3679_v53 = vpop.f32.mrb[14].mxu1  ;;  %v3616_v54 = vpop.f32.mrb[15].mxu0 }
 0x173   : > { %v3617_v55 = vadd.f32 %v3616_v54, %v3615_v49  ;;  %v3680_v56 = vpop.f32.mrb[15].mxu1 }
 0x174   : > { %v5228_v57 = vadd.f32 %v3678_v52, %v3614_v21  ;;  %v3681_v60 = vadd.f32 %v3680_v56, %v3679_v53 }
 0x176   : > { %v5230_v61 = vadd.f32 %v3681_v60, %v3617_v55 }
 0x177   : > { %v3618_v62 = vpop.f32.mrb[16].mxu0 }
 0x178   : > { %v3682_v63 = vpop.f32.mrb[16].mxu1  ;;  %v3619_v0 = vpop.f32.mrb[17].mxu0 }
 0x179   : > { %v3620_v2 = vadd.f32 %v3619_v0, %v3618_v62  ;;  %v3683_v6 = vpop.f32.mrb[17].mxu1  ;;  %v3621_v7 = vpop.f32.mrb[18].mxu0 }
 0x17a   : > { %v3684_v11 = vadd.f32 %v3683_v6, %v3682_v63  ;;  %v3685_v13 = vpop.f32.mrb[18].mxu1  ;;  %v3622_v1 = vpop.f32.mrb[19].mxu0 }
 0x17b   : > { %v3623_v4 = vadd.f32 %v3622_v1, %v3621_v7  ;;  %v3686_v8 = vpop.f32.mrb[19].mxu1 }
 0x17c   : > { %v5232_v10 = vadd.f32 %v3684_v11, %v3620_v2  ;;  %v3687_v18 = vadd.f32 %v3686_v8, %v3685_v13 }
 0x17e   : > { %v5234_v19 = vadd.f32 %v3687_v18, %v3623_v4 }
 0x183   : > { %v3624_v26 = vpop.f32.mrb[20].mxu0 }
 0x184   : > { %v3688_v27 = vpop.f32.mrb[20].mxu1  ;;  %v3625_v34 = vpop.f32.mrb[21].mxu0 }
 0x185   : > { %v3626_v35 = vadd.f32 %v3625_v34, %v3624_v26  ;;  %v3689_v42 = vpop.f32.mrb[21].mxu1  ;;  %v3627_v50 = vpop.f32.mrb[22].mxu0 }
 0x186   : > { %v3690_v58 = vadd.f32 %v3689_v42, %v3688_v27  ;;  %v3691_v59 = vpop.f32.mrb[22].mxu1  ;;  %v3628_v3 = vpop.f32.mrb[23].mxu0 }
 0x187   : > { %v3629_v12 = vadd.f32 %v3628_v3, %v3627_v50  ;;  %v3692_v5 = vpop.f32.mrb[23].mxu1 }
 0x188   : > { %v5236_v9 = vadd.f32 %v3690_v58, %v3626_v35  ;;  %v3693_v14 = vadd.f32 %v3692_v5, %v3691_v59 }
 0x18a   : > { %v5238_v15 = vadd.f32 %v3693_v14, %v3629_v12 }
 0x19f   : > { %v3630_v23 = vpop.f32.mrb[24].mxu0 }
 0x1a0   : > { %v3694_v24 = vpop.f32.mrb[24].mxu1  ;;  %v3631_v28 = vpop.f32.mrb[25].mxu0 }
 0x1a1   : > { %v3632_v30 = vadd.f32 %v3631_v28, %v3630_v23  ;;  %v3695_v31 = vpop.f32.mrb[25].mxu1  ;;  %v3633_v32 = vpop.f32.mrb[26].mxu0 }
 0x1a2   : > { %v3696_v33 = vadd.f32 %v3695_v31, %v3694_v24  ;;  %v3697_v36 = vpop.f32.mrb[26].mxu1  ;;  %v3634_v37 = vpop.f32.mrb[27].mxu0 }
 0x1a3   : > { %v3635_v38 = vadd.f32 %v3634_v37, %v3633_v32  ;;  %v3698_v39 = vpop.f32.mrb[27].mxu1 }
 0x1a4   : > { %v5247_v40 = vadd.f32 %v3696_v33, %v3632_v30  ;;  %v3699_v41 = vadd.f32 %v3698_v39, %v3697_v36 }
 0x1a6   : > { %v5249_v44 = vadd.f32 %v3699_v41, %v3635_v38 }
 0x1bb   : > { %v3636_v46 = vpop.f32.mrb[28].mxu0 }
 0x1bc   : > { %v3700_v16 = vpop.f32.mrb[28].mxu1  ;;  %v3637_v17 = vpop.f32.mrb[29].mxu0 }
 0x1bd   : > { %v3638_v20 = vadd.f32 %v3637_v17, %v3636_v46  ;;  %v3701_v21 = vpop.f32.mrb[29].mxu1  ;;  %v3639_v48 = vpop.f32.mrb[30].mxu0 }
 0x1be   : > { %v3702_v49 = vadd.f32 %v3701_v21, %v3700_v16  ;;  %v3703_v52 = vpop.f32.mrb[30].mxu1  ;;  %v3640_v53 = vpop.f32.mrb[31].mxu0 }
 0x1bf   : > { %v3641_v54 = vadd.f32 %v3640_v53, %v3639_v48  ;;  %v3704_v55 = vpop.f32.mrb[31].mxu1 }
 0x1c0   : > { %v5251_v56 = vadd.f32 %v3702_v49, %v3638_v20  ;;  %v3705_v60 = vadd.f32 %v3704_v55, %v3703_v52 }
 0x1c2   : > { %v5253_v62 = vadd.f32 %v3705_v60, %v3641_v54 }
 0x1d7   : > { %v3722_v63 = vpop.f32.mrb[32].mxu0 }
 0x1d8   : > { %v3786_v0 = vpop.f32.mrb[32].mxu1  ;;  %v3723_v2 = vpop.f32.mrb[33].mxu0 }
 0x1d9   : > { %v3724_v6 = vadd.f32 %v3723_v2, %v3722_v63  ;;  %v3787_v7 = vpop.f32.mrb[33].mxu1  ;;  %v3725_v11 = vpop.f32.mrb[34].mxu0 }
 0x1da   : > { %v3788_v13 = vadd.f32 %v3787_v7, %v3786_v0  ;;  %v3789_v1 = vpop.f32.mrb[34].mxu1  ;;  %v3726_v4 = vpop.f32.mrb[35].mxu0 }
 0x1db   : > { %v1993_v8 = vadd.f32 %v3724_v6, %v5216_v43  ;;  %v3727_v18 = vadd.f32 %v3726_v4, %v3725_v11  ;;  %v3790_v26 = vpop.f32.mrb[35].mxu1 }
 0x1dc   : > { %v3791_v27 = vadd.f32 %v3790_v26, %v3789_v1 }
 0x1dd   : > { %v2090_v34 = vadd.f32 %v3788_v13, %v1993_v8  ;;  %v1996_v35 = vadd.f32 %v3727_v18, %v5218_v51 }
 0x1df   : > { %v2093_v42 = vadd.f32 %v3791_v27, %v1996_v35  ;;  %v3728_v50 = vpop.f32.mrb[36].mxu0 }
 0x1e0   : > { %v3792_v58 = vpop.f32.mrb[36].mxu1  ;;  %v3729_v59 = vpop.f32.mrb[37].mxu0 }
 0x1e1   : > { %v3730_v3 = vadd.f32 %v3729_v59, %v3728_v50  ;;  %v3793_v12 = vpop.f32.mrb[37].mxu1  ;;  %v3731_v5 = vpop.f32.mrb[38].mxu0  ;;  %v2152_v14 = vpack.c.bf16 %v2093_v42, %v2090_v34 }
 0x1e2   : > { %v3794_v22 = vadd.f32 %v3793_v12, %v3792_v58  ;;  %v3795_v23 = vpop.f32.mrb[38].mxu1  ;;  %v3732_v24 = vpop.f32.mrb[39].mxu0 }
 0x1e3   : > { %v2001_v28 = vadd.f32 %v3730_v3, %v5220_v25  ;;  %v3733_v43 = vadd.f32 %v3732_v24, %v3731_v5  ;;  %v3796_v30 = vpop.f32.mrb[39].mxu1  ;;  %3874 = vmatprep.subr.bf16.mxu1 %v2152_v14 }
 0x1e4   : > { %v3797_v31 = vadd.f32 %v3796_v30, %v3795_v23  ;;  %3875 = vmatpush3.bf16.msra.mxu1 %v2152_v14 }
 0x1e5   : > { %v2098_v32 = vadd.f32 %v3794_v22, %v2001_v28  ;;  %v2004_v51 = vadd.f32 %v3733_v43, %v5222_v29 }
 0x1e7   : > { %v2101_v33 = vadd.f32 %v3797_v31, %v2004_v51  ;;  %v3734_v36 = vpop.f32.mrb[40].mxu0 }
 0x1e8   : > { %v3798_v37 = vpop.f32.mrb[40].mxu1  ;;  %v3735_v38 = vpop.f32.mrb[41].mxu0 }
 0x1e9   : > { %v3736_v39 = vadd.f32 %v3735_v38, %v3734_v36  ;;  %v3799_v41 = vpop.f32.mrb[41].mxu1  ;;  %v3737_v46 = vpop.f32.mrb[42].mxu0  ;;  %v2153_v16 = vpack.c.bf16 %v2101_v33, %v2098_v32 }
 0x1ea   : > { %v3800_v17 = vadd.f32 %v3799_v41, %v3798_v37  ;;  %v3801_v20 = vpop.f32.mrb[42].mxu1  ;;  %v3738_v21 = vpop.f32.mrb[43].mxu0 }
 0x1eb   : > { %v2009_v25 = vadd.f32 %v3736_v39, %v5224_v45  ;;  %v3739_v48 = vadd.f32 %v3738_v21, %v3737_v46  ;;  %v3802_v49 = vpop.f32.mrb[43].mxu1  ;;  %3876 = vmatprep.subr.bf16.mxu1 %v2153_v16 }
 0x1ec   : > { %v3803_v52 = vadd.f32 %v3802_v49, %v3801_v20  ;;  %3877 = vmatpush3.bf16.msra.mxu1 %v2153_v16 }
 0x1ed   : > { %v2106_v53 = vadd.f32 %v3800_v17, %v2009_v25  ;;  %v2012_v29 = vadd.f32 %v3739_v48, %v5226_v47 }
 0x1ef   : > { %v2109_v54 = vadd.f32 %v3803_v52, %v2012_v29  ;;  %v3740_v55 = vpop.f32.mrb[44].mxu0 }
 0x1f0   : > { %v3804_v60 = vpop.f32.mrb[44].mxu1  ;;  %v3741_v63 = vpop.f32.mrb[45].mxu0 }
 0x1f1   : > { %v3742_v0 = vadd.f32 %v3741_v63, %v3740_v55  ;;  %v3805_v2 = vpop.f32.mrb[45].mxu1  ;;  %v3743_v6 = vpop.f32.mrb[46].mxu0  ;;  %v2154_v7 = vpack.c.bf16 %v2109_v54, %v2106_v53 }
 0x1f2   : > { %v3806_v11 = vadd.f32 %v3805_v2, %v3804_v60  ;;  %v3807_v13 = vpop.f32.mrb[46].mxu1  ;;  %v3744_v1 = vpop.f32.mrb[47].mxu0 }
 0x1f3   : > { %v2017_v45 = vadd.f32 %v3742_v0, %v5228_v57  ;;  %v3745_v4 = vadd.f32 %v3744_v1, %v3743_v6  ;;  %v3808_v8 = vpop.f32.mrb[47].mxu1  ;;  %3878 = vmatprep.subr.bf16.mxu1 %v2154_v7 }
 0x1f4   : > { %v3809_v18 = vadd.f32 %v3808_v8, %v3807_v13  ;;  %3879 = vmatpush3.bf16.msra.mxu1 %v2154_v7 }
 0x1f5   : > { %v2114_v26 = vadd.f32 %v3806_v11, %v2017_v45  ;;  %v2020_v47 = vadd.f32 %v3745_v4, %v5230_v61 }
 0x1f7   : > { %v2117_v27 = vadd.f32 %v3809_v18, %v2020_v47  ;;  %v3746_v34 = vpop.f32.mrb[48].mxu0 }
 0x1f8   : > { %v3810_v35 = vpop.f32.mrb[48].mxu1  ;;  %v3747_v42 = vpop.f32.mrb[49].mxu0 }
 0x1f9   : > { %v3748_v50 = vadd.f32 %v3747_v42, %v3746_v34  ;;  %v3811_v58 = vpop.f32.mrb[49].mxu1  ;;  %v3749_v59 = vpop.f32.mrb[50].mxu0  ;;  %v2155_v3 = vpack.c.bf16 %v2117_v27, %v2114_v26 }
 0x1fa   : > { %v3812_v12 = vadd.f32 %v3811_v58, %v3810_v35  ;;  %v3813_v5 = vpop.f32.mrb[50].mxu1  ;;  %v3750_v14 = vpop.f32.mrb[51].mxu0 }
 0x1fb   : > { %v2025_v57 = vadd.f32 %v3748_v50, %v5232_v10  ;;  %v3751_v22 = vadd.f32 %v3750_v14, %v3749_v59  ;;  %v3814_v23 = vpop.f32.mrb[51].mxu1  ;;  %3880 = vmatprep.subr.bf16.mxu1 %v2155_v3  ;;  %v4149_v14 = vmov 0  }
 0x1fc   : > { %v3815_v24 = vadd.f32 %v3814_v23, %v3813_v5  ;;  %3881 = vmatpush3.bf16.msra.mxu1 %v2155_v3  ;;  %v4034_v5 = vld [vmem:[%s5244_s17 + $0x10] sm:$0xff]   ;;  %4030 = vset.pattern.permute.xlu0 %v4149_v14 }
 0x1fd   : > { %v2122_v28 = vadd.f32 %v3812_v12, %v2025_v57  ;;  %v2028_v61 = vadd.f32 %v3751_v22, %v5234_v19  ;;  %v4033_v12 = vld [vmem:[%s5244_s17 + $0x8] sm:$0xff]   ;;  %4031 = vset.pattern.permute.xlu1 %v4149_v14  ;;  %v2269_v57 = vld [vmem:[%s5290_s16] sm:$0xff]  ;;  %v2271_v23 = vld [vmem:[%s5290_s16 + $0x10] sm:$0xff] }
 0x1fe   : > { %2287 = vperm.xlu0 %4030, %v2269_v57   ;;  %v2270_v22 = vld [vmem:[%s5290_s16 + $0x8] sm:$0xff]  ;;  %2297 = vperm.xlu1 %4031, %v2271_v23  }
 0x1ff   : > { %v2125_v43 = vadd.f32 %v3815_v24, %v2028_v61  ;;  %v3752_v30 = vpop.f32.mrb[52].mxu0  ;;  %v2273_v24 = vld [vmem:[%s5290_s16 + $0x20] sm:$0xff]  ;;  %v2275_v61 = vld [vmem:[%s5290_s16 + $0x30] sm:$0xff] }
 0x200   : > { %v3816_v31 = vpop.f32.mrb[52].mxu1  ;;  %v3753_v32 = vpop.f32.mrb[53].mxu0 }
 0x201   : > { %v3754_v51 = vadd.f32 %v3753_v32, %v3752_v30  ;;  %v3817_v33 = vpop.f32.mrb[53].mxu1  ;;  %v3755_v36 = vpop.f32.mrb[54].mxu0  ;;  %v2156_v37 = vpack.c.bf16 %v2125_v43, %v2122_v28  ;;  %v2272_v28 = vld [vmem:[%s5290_s16 + $0x18] sm:$0xff]  ;;  %v2274_v43 = vld [vmem:[%s5290_s16 + $0x28] sm:$0xff]  ;;  %v2277_v30 = vld [vmem:[%s5290_s16 + $0x40] sm:$0xff] }
 0x202   : > { %v3818_v38 = vadd.f32 %v3817_v33, %v3816_v31  ;;  %v3819_v39 = vpop.f32.mrb[54].mxu1  ;;  %v3756_v41 = vpop.f32.mrb[55].mxu0  ;;  %2292 = vperm.xlu0 %4030, %v2270_v22   ;;  %2302 = vperm.xlu1 %4031, %v2272_v28   ;;  %v2276_v31 = vld [vmem:[%s5290_s16 + $0x38] sm:$0xff]  ;;  %v2279_v32 = vld [vmem:[%s5290_s16 + $0x50] sm:$0xff]  ;;  %v2281_v33 = vld [vmem:[%s5290_s16 + $0x60] sm:$0xff] }
 0x203   : > { %v2033_v10 = vadd.f32 %v3754_v51, %v5236_v9  ;;  %v3757_v46 = vadd.f32 %v3756_v41, %v3755_v36  ;;  %v3820_v16 = vpop.f32.mrb[55].mxu1  ;;  %3882 = vmatprep.subr.bf16.mxu1 %v2156_v37  ;;  %v2278_v51 = vld [vmem:[%s5290_s16 + $0x48] sm:$0xff]  ;;  %v2280_v36 = vld [vmem:[%s5290_s16 + $0x58] sm:$0xff] }
 0x204   : > { %v3821_v17 = vadd.f32 %v3820_v16, %v3819_v39  ;;  %3883 = vmatpush3.bf16.msra.mxu1 %v2156_v37  ;;  %v2283_v37 = vld [vmem:[%s5290_s16 + $0x70] sm:$0xff]  ;;  %v2567_v39 = vld [vmem:[%s5312_s22] sm:$0xff]  ;;  %v2284_v41 = vld [vmem:[%s5290_s16 + $0x78] sm:$0xff] }
 0x205   : > { %v2130_v20 = vadd.f32 %v3818_v38, %v2033_v10  ;;  %v2036_v19 = vadd.f32 %v3757_v46, %v5238_v15  ;;  %v2282_v38 = vld [vmem:[%s5290_s16 + $0x68] sm:$0xff]  ;;  %v2569_v10 = vld [vmem:[%s5312_s22 + $0x10] sm:$0xff]  ;;  %v2571_v16 = vld [vmem:[%s5312_s22 + $0x20] sm:$0xff]  ;;  %s3569_s16 = sshll.u32 %s4134_s28, 5 }
 0x206   : > { %2307 = vperm.xlu0 %4030, %v2273_v24   ;;  %2312 = vperm.xlu1 %4031, %v2274_v43   ;;  %v2568_v46 = vld [vmem:[%s5312_s22 + $0x8] sm:$0xff] }
 0x207   : > { %v2133_v21 = vadd.f32 %v3821_v17, %v2036_v19  ;;  %v3758_v25 = vpop.f32.mrb[56].mxu0  ;;  %v2570_v17 = vld [vmem:[%s5312_s22 + $0x18] sm:$0xff]  ;;  %v2572_v19 = vld [vmem:[%s5312_s22 + $0x28] sm:$0xff] }
 0x208   : > { %v3822_v48 = vpop.f32.mrb[56].mxu1  ;;  %v3759_v49 = vpop.f32.mrb[57].mxu0 }
 0x209   : > { %v3760_v52 = vadd.f32 %v3759_v49, %v3758_v25  ;;  %v3823_v53 = vpop.f32.mrb[57].mxu1  ;;  %v3761_v29 = vpop.f32.mrb[58].mxu0  ;;  %v2157_v54 = vpack.c.bf16 %v2133_v21, %v2130_v20  ;;  %v2573_v20 = vld [vmem:[%s5312_s22 + $0x30] sm:$0xff]  ;;  %v2575_v21 = vld [vmem:[%s5312_s22 + $0x40] sm:$0xff]  ;;  %v2574_v25 = vld [vmem:[%s5312_s22 + $0x38] sm:$0xff] }
 0x20a   : > { %v3824_v55 = vadd.f32 %v3823_v53, %v3822_v48  ;;  %v3825_v60 = vpop.f32.mrb[58].mxu1  ;;  %v3762_v63 = vpop.f32.mrb[59].mxu0  ;;  %2317 = vperm.xlu0 %4030, %v2275_v61   ;;  %2322 = vperm.xlu1 %4031, %v2276_v31   ;;  %v2577_v48 = vld [vmem:[%s5312_s22 + $0x50] sm:$0xff]  ;;  %v2576_v49 = vld [vmem:[%s5312_s22 + $0x48] sm:$0xff]  ;;  %v2578_v53 = vld [vmem:[%s5312_s22 + $0x58] sm:$0xff] }
 0x20b   : > { %v2041_v9 = vadd.f32 %v3760_v52, %v5247_v40  ;;  %v3763_v0 = vadd.f32 %v3762_v63, %v3761_v29  ;;  %v3826_v2 = vpop.f32.mrb[59].mxu1  ;;  %3884 = vmatprep.subr.bf16.mxu1 %v2157_v54  ;;  %v2579_v52 = vld [vmem:[%s5312_s22 + $0x60] sm:$0xff]  ;;  %v2581_v29 = vld [vmem:[%s5312_s22 + $0x70] sm:$0xff] }
 0x20c   : > { %v3827_v6 = vadd.f32 %v3826_v2, %v3825_v60  ;;  %3885 = vmatpush3.bf16.msra.mxu1 %v2157_v54  ;;  %v2580_v54 = vld [vmem:[%s5312_s22 + $0x68] sm:$0xff] }
 0x20d   : > { %v2138_v7 = vadd.f32 %v3824_v55, %v2041_v9  ;;  %v2044_v15 = vadd.f32 %v3763_v0, %v5249_v44  ;;  %v2582_v55 = vld [vmem:[%s5312_s22 + $0x78] sm:$0xff] }
 0x20e   : > { %2327 = vperm.xlu0 %4030, %v2277_v30   ;;  %2332 = vperm.xlu1 %4031, %v2278_v51  }
 0x20f   : > { %v2141_v11 = vadd.f32 %v3827_v6, %v2044_v15  ;;  %v3764_v13 = vpop.f32.mrb[60].mxu0 }
 0x210   : > { %v3828_v1 = vpop.f32.mrb[60].mxu1  ;;  %v3765_v45 = vpop.f32.mrb[61].mxu0 }
 0x211   : > { %v3766_v4 = vadd.f32 %v3765_v45, %v3764_v13  ;;  %v3829_v8 = vpop.f32.mrb[61].mxu1  ;;  %v3767_v18 = vpop.f32.mrb[62].mxu0  ;;  %v2158_v26 = vpack.c.bf16 %v2141_v11, %v2138_v7 }
 0x212   : > { %v3830_v47 = vadd.f32 %v3829_v8, %v3828_v1  ;;  %v3831_v40 = vpop.f32.mrb[62].mxu1  ;;  %v3768_v27 = vpop.f32.mrb[63].mxu0  ;;  %2337 = vperm.xlu0 %4030, %v2279_v32   ;;  %2342 = vperm.xlu1 %4031, %v2280_v36   ;;  %v4038_v8 = vld [vmem:[%s5280_s23 + $0x10] sm:$0xff]  }
 0x213   : > { %v2049_v34 = vadd.f32 %v3766_v4, %v5251_v56  ;;  %v3769_v35 = vadd.f32 %v3768_v27, %v3767_v18  ;;  %v3832_v42 = vpop.f32.mrb[63].mxu1  ;;  %3886 = vmatprep.subr.bf16.mxu1 %v2158_v26  ;;  %v4035_v56 = vld [vmem:[%s5244_s17 + $0x18] sm:$0xff]   ;;  %v4037_v4 = vld [vmem:[%s5280_s23 + $0x8] sm:$0xff]   ;;  %s2852_s17 = sadd.s32 %s4130_s27, %s3569_s16 }
 0x214   : > { %v3833_v44 = vadd.f32 %v3832_v42, %v3831_v40  ;;  %3887 = vmatpush3.bf16.msra.mxu1 %v2158_v26  ;;  %v4039_v18 = vld [vmem:[%s5280_s23 + $0x18] sm:$0xff]   ;;  %v4040_v26 = vld [vmem:[%s5280_s23 + $0x20] sm:$0xff]   ;;  %v4042_v40 = vld [vmem:[%s5280_s23 + $0x30] sm:$0xff]   ;;  %s3570_s21 = sshll.u32 %s2852_s17, 7 }
 0x215   : > { %v2146_v50 = vadd.f32 %v3830_v47, %v2049_v34  ;;  %v2052_v58 = vadd.f32 %v3769_v35, %v5253_v62  ;;  %v4036_v62 = vld [vmem:[%s5280_s23] sm:$0xff]   ;;  %v4041_v47 = vld [vmem:[%s5280_s23 + $0x28] sm:$0xff]   ;;  %v4043_v27 = vld [vmem:[%s5280_s23 + $0x38] sm:$0xff]   ;;  %s5363_s23 = scalar_lea.vmem [#allocation2], %s3013_s18  ;;  %s5383_s9 = scalar_lea.hbm %s5452_s7, %s3570_s21 }
 0x216   : > { %2347 = vperm.xlu0 %4030, %v2281_v33   ;;  %2352 = vperm.xlu1 %4031, %v2282_v38   ;;  %v4044_v34 = vld [vmem:[%s5350_s13] sm:$0xff]   ;;  %s2855_s28 = sshll.u32 %s5363_s23, 4  ;;  %s4150_s18 = smov [#allocation2]   ;;  %s5386_s28 = int_to_ptr.vmem [resolvable:$true] %s2855_s28 }
 0x217   : > { %v2149_v59 = vadd.f32 %v3833_v44, %v2052_v58  ;;  %3938 = vmatprep.mubr.bf16.mxu0 %v4044_v34  ;;  %s4056_s16 = sshll.u32 %s4150_s18, 4  ;;  %s4057_s16 = int_to_ptr.vmem [resolvable:$false] %s4056_s16 }
 0x218   : > { %s4058_s17 = scalar_lea.vmem %s4057_s16, 4096  ;;  %p4059_p5 = scmp.lt.s32.totalorder %s5386_s28, %s4057_s16 }
 0x219   : > { %v2159_v3 = vpack.c.bf16 %v2149_v59, %v2146_v50 }
 0x21a   : > { %2357 = vperm.xlu0 %4030, %v2283_v37   ;;  %2362 = vperm.xlu1 %4031, %v2284_v41  }
 0x21b   : > { %3888 = vmatprep.subr.bf16.mxu1 %v2159_v3 }
 0x21c   : > { %3889 = vmatpush3.bf16.msra.mxu1 %v2159_v3 }
 0x21e   : > { %2585 = vperm.xlu0 %4030, %v2567_v39   ;;  %2590 = vperm.xlu1 %4031, %v2568_v46  }
 0x21f   : > { %3891 = vmatmul.mubr.bf16.vlgmr.msra.gmra.mrb[64].mxu1 %v4033_v12 }
 0x220   : > { %3894 = vmatprep.mubr.bf16.mxu1 %v4034_v5 }
 0x222   : > { %2595 = vperm.xlu0 %4030, %v2569_v10   ;;  %2600 = vperm.xlu1 %4031, %v2570_v17  }
 0x226   : > { %2605 = vperm.xlu0 %4030, %v2571_v16   ;;  %2610 = vperm.xlu1 %4031, %v2572_v19  }
 0x227   : > { %3895 = vmatmul.mubr.bf16.gmra.mrb[68].mxu1 %v4035_v56 }
 0x228   : > { %3906 = vmatprep.mubr.msk.bf16.mxu1 %vm2405_vm11, %v4036_v62 }
 0x22a   : > { %2615 = vperm.xlu0 %4030, %v2573_v20   ;;  %2620 = vperm.xlu1 %4031, %v2574_v25  }
 0x22e   : > { %2625 = vperm.xlu0 %4030, %v2575_v21   ;;  %2630 = vperm.xlu1 %4031, %v2576_v49  }
 0x232   : > { %2635 = vperm.xlu0 %4030, %v2577_v48   ;;  %2640 = vperm.xlu1 %4031, %v2578_v53  }
 0x236   : > { %2645 = vperm.xlu0 %4030, %v2579_v52   ;;  %2650 = vperm.xlu1 %4031, %v2580_v54  }
 0x23a   : > { %2655 = vperm.xlu0 %4030, %v2581_v29   ;;  %2660 = vperm.xlu1 %4031, %v2582_v55  }
 0x27d   : > { %v2288_v35 = vpop.permute.xlu0 %2287  ;;  %v2298_v42 = vpop.permute.xlu1 %2297 }
 0x281   : > { %v2293_v44 = vpop.permute.xlu0 %2292  ;;  %v2303_v50 = vpop.permute.xlu1 %2302 }
 0x285   : > { %v2308_v58 = vpop.permute.xlu0 %2307  ;;  %v2313_v59 = vpop.permute.xlu1 %2312 }
 0x289   : > { %v2318_v3 = vpop.permute.xlu0 %2317  ;;  %v2323_v62 = vpop.permute.xlu1 %2322 }
 0x28d   : > { %v2328_v43 = vpop.permute.xlu0 %2327  ;;  %v2333_v51 = vpop.permute.xlu1 %2332 }
 0x291   : > { %v2338_v16 = vpop.permute.xlu0 %2337  ;;  %v2343_v21 = vpop.permute.xlu1 %2342 }
 0x295   : > { %v2348_v55 = vpop.permute.xlu0 %2347 }
 0x2f2   : > { %v3892_v60 = vpop.f32.mrb[64].mxu1 }
 0x2f3   : > { %v2218_v63 = vpop.f32.mrb[65].mxu1 }
 0x2f4   : > { %v3893_v9 = vpop.f32.mrb[66].mxu1 }
 0x2f5   : > { %v2266_v0 = vpack.c.bf16 %v3893_v9, %v3892_v60  ;;  %v2221_v2 = vpop.f32.mrb[67].mxu1 }
 0x2f6   : > { %v2265_v6 = vpack.c.bf16 %v2221_v2, %v2218_v63  ;;  %v2353_v2 = vpop.permute.xlu1 %2352 }
 0x2f8   : > { %3898 = vmatprep.subr.bf16.mxu1 %v2265_v6 }
 0x2f9   : > { %3899 = vmatpush3.bf16.msra.mxu1 %v2265_v6 }
 0x2fa   : > { %v3896_v7 = vpop.f32.mrb[68].mxu1  ;;  %3900 = vmatprep.subr.bf16.mxu1 %v2266_v0 }
 0x2fb   : > { %v2234_v15 = vpop.f32.mrb[69].mxu1 }
 0x2fc   : > { %v3897_v11 = vpop.f32.mrb[70].mxu1 }
 0x2fd   : > { %v2268_v13 = vpack.c.bf16 %v3897_v11, %v3896_v7  ;;  %v2237_v1 = vpop.f32.mrb[71].mxu1  ;;  %3901 = vmatpush3.bf16.msra.mxu1 %v2266_v0 }
 0x2fe   : > { %v2267_v45 = vpack.c.bf16 %v2237_v1, %v2234_v15 }
 0x300   : > { %3902 = vmatprep.subr.bf16.mxu1 %v2267_v45 }
 0x301   : > { %3903 = vmatpush3.bf16.msra.mxu1 %v2267_v45  ;;  %v2358_v45 = vpop.permute.xlu0 %2357 }
 0x302   : > { %3904 = vmatprep.subr.bf16.mxu1 %v2268_v13 }
 0x305   : > { %3905 = vmatpush3.bf16.msra.mxu1 %v2268_v13 }
 0x308   : > { %3907 = vmatmul.mubr.msk.bf16.vlgmr.msra.gmra.mrb[72].mxu1 %vm2405_vm11, %v4037_v4 }
 0x309   : > { %3910 = vmatprep.mubr.msk.bf16.mxu1 %vm2405_vm11, %v4038_v8 }
 0x310   : > { %3911 = vmatmul.mubr.msk.bf16.gmra.mrb[76].mxu1 %vm2405_vm11, %v4039_v18 }
 0x311   : > { %3914 = vmatprep.mubr.msk.bf16.mxu1 %vm2405_vm11, %v4040_v26 }
 0x318   : > { %3915 = vmatmul.mubr.msk.bf16.gmra.mrb[80].mxu1 %vm2405_vm11, %v4041_v47  ;;  %v2363_v47 = vpop.permute.xlu1 %2362 }
 0x319   : > { %3918 = vmatprep.mubr.msk.bf16.mxu1 %vm2405_vm11, %v4042_v40 }
 0x320   : > { %3919 = vmatmul.mubr.msk.bf16.gmra.mrb[84].mxu1 %vm2405_vm11, %v4043_v27 }
 0x3db   : > { %v3908_v12 = vpop.f32.mrb[72].mxu1 }
 0x3dc   : > { %v2473_v5 = vadd.f32 %v3908_v12, %v2298_v42  ;;  %v2464_v56 = vpop.f32.mrb[73].mxu1 }
 0x3dd   : > { %v2465_v14 = vadd.f32 %v2464_v56, %v2288_v35  ;;  %v3909_v57 = vpop.f32.mrb[74].mxu1  ;;  %v4046_v56 = vld [vmem:[%s5350_s13 + $0x10] sm:$0xff]  }
 0x3de   : > { %v2476_v22 = vadd.f32 %v3909_v57, %v2303_v50  ;;  %v2467_v23 = vpop.f32.mrb[75].mxu1  ;;  %v2529_v28 = vmax.f32 %v2473_v5, 0.0  ;;  %v4045_v5 = vld [vmem:[%s5350_s13 + $0x8] sm:$0xff]  }
 0x3df   : > { %v2468_v24 = vadd.f32 %v2467_v23, %v2293_v44  ;;  %v2527_v30 = vmax.f32 %v2465_v14, 0.0  ;;  %v4048_v14 = vld [vmem:[%s5350_s13 + $0x20] sm:$0xff]   ;;  %v4049_v57 = vld [vmem:[%s5350_s13 + $0x28] sm:$0xff]   ;;  %v4051_v23 = vld [vmem:[%s5350_s13 + $0x38] sm:$0xff]  }
 0x3e0   : > { %v2530_v61 = vmax.f32 %v2476_v22, 0.0  ;;  %v4050_v22 = vld [vmem:[%s5350_s13 + $0x30] sm:$0xff]  }
 0x3e1   : > { %v2528_v31 = vmax.f32 %v2468_v24, 0.0  ;;  %v2586_v24 = vpop.permute.xlu0 %2585 }
 0x3e2   : > { %v2560_v32 = vpack.c.bf16 %v2530_v61, %v2529_v28  ;;  %v2591_v28 = vpop.permute.xlu1 %2590 }
 0x3e3   : > { %v2559_v33 = vpack.c.bf16 %v2528_v31, %v2527_v30  ;;  %v3912_v36 = vpop.f32.mrb[76].mxu1 }
 0x3e4   : > { %v2489_v37 = vadd.f32 %v3912_v36, %v2318_v3  ;;  %v2480_v38 = vpop.f32.mrb[77].mxu1 }
 0x3e5   : > { %v2481_v39 = vadd.f32 %v2480_v38, %v2308_v58  ;;  %v3913_v41 = vpop.f32.mrb[78].mxu1  ;;  %3922 = vmatprep.subr.bf16.mxu0 %v2559_v33  ;;  %v2596_v61 = vpop.permute.xlu0 %2595 }
 0x3e6   : > { %v2492_v10 = vadd.f32 %v3913_v41, %v2323_v62  ;;  %v2483_v46 = vpop.f32.mrb[79].mxu1  ;;  %3923 = vmatpush3.bf16.msra.mxu0 %v2559_v33  ;;  %v2533_v20 = vmax.f32 %v2489_v37, 0.0  ;;  %v4047_v62 = vld [vmem:[%s5350_s13 + $0x18] sm:$0xff]   ;;  %s4052_s13 = scalar_lea.vmem %s5386_s28, 2048 }
 0x3e7   : > { %v2484_v17 = vadd.f32 %v2483_v46, %v2313_v59  ;;  %3924 = vmatprep.subr.bf16.mxu0 %v2560_v32  ;;  %v2531_v25 = vmax.f32 %v2481_v39, 0.0  ;;  %p4053_p1 = scmp.ne.s32.totalorder %s5386_s28, %s4052_s13  ;;  %p4060_p6 = scmp.lt.s32.totalorder %s4058_s17, %s4052_s13 }
 0x3e8   : > { %v2534_v19 = vmax.f32 %v2492_v10, 0.0 }
 0x3e9   : > { %v2532_v48 = vmax.f32 %v2484_v17, 0.0  ;;  %v2606_v30 = vpop.permute.xlu0 %2605  ;;  %p4054_p2 = pnand %p4053_p1, %p4245_p3  ;;  %p4061_p7 = por %p4060_p6, %p4059_p5 }
 0x3ea   : > { %v2562_v49 = vpack.c.bf16 %v2534_v19, %v2533_v20  ;;  %3925 = vmatpush3.bf16.msra.mxu0 %v2560_v32 }
 0x3eb   : > { %v2561_v52 = vpack.c.bf16 %v2532_v48, %v2531_v25  ;;  %v3916_v53 = vpop.f32.mrb[80].mxu1  ;;  %p4055_p4 = pneg %p4054_p2 }
 0x3ec   : > { %v2505_v29 = vadd.f32 %v3916_v53, %v2338_v16  ;;  %v2496_v54 = vpop.f32.mrb[81].mxu1 }
 0x3ed   : > { %v2497_v60 = vadd.f32 %v2496_v54, %v2328_v43  ;;  %v3917_v63 = vpop.f32.mrb[82].mxu1  ;;  %3926 = vmatprep.subr.bf16.mxu0 %v2561_v52  ;;  %v2601_v43 = vpop.permute.xlu1 %2600  ;;  %p4062_p9 = pnand %p4061_p7, %p4055_p4 }
 0x3ee   : > { %v2508_v9 = vadd.f32 %v3917_v63, %v2343_v21  ;;  %v2499_v0 = vpop.f32.mrb[83].mxu1  ;;  %3927 = vmatpush3.bf16.msra.mxu0 %v2561_v52  ;;  %v2537_v7 = vmax.f32 %v2505_v29, 0.0  ;;  %v2616_v32 = vpop.permute.xlu0 %2615 }
 0x3ef   : > { %v2500_v6 = vadd.f32 %v2499_v0, %v2333_v51  ;;  %3928 = vmatprep.subr.bf16.mxu0 %v2562_v49  ;;  %v2535_v11 = vmax.f32 %v2497_v60, 0.0 }
 0x3f0   : > { %v2538_v15 = vmax.f32 %v2508_v9, 0.0 }
 0x3f1   : > { %v2536_v13 = vmax.f32 %v2500_v6, 0.0  ;;  %v2611_v31 = vpop.permute.xlu1 %2610 }
 0x3f2   : > { %v2564_v1 = vpack.c.bf16 %v2538_v15, %v2537_v7  ;;  %3929 = vmatpush3.bf16.msra.mxu0 %v2562_v49  ;;  %v2626_v19 = vpop.permute.xlu0 %2625 }
 0x3f3   : > { %v2563_v4 = vpack.c.bf16 %v2536_v13, %v2535_v11  ;;  %v3920_v8 = vpop.f32.mrb[84].mxu1 }
 0x3f4   : > { %v2521_v18 = vadd.f32 %v3920_v8, %v2358_v45  ;;  %v2512_v26 = vpop.f32.mrb[85].mxu1 }
 0x3f5   : > { %v2513_v40 = vadd.f32 %v2512_v26, %v2348_v55  ;;  %v3921_v27 = vpop.f32.mrb[86].mxu1  ;;  %3930 = vmatprep.subr.bf16.mxu0 %v2563_v4  ;;  %v2621_v37 = vpop.permute.xlu1 %2620 }
 0x3f6   : > { %v2524_v34 = vadd.f32 %v3921_v27, %v2363_v47  ;;  %v2515_v35 = vpop.f32.mrb[87].mxu1  ;;  %3931 = vmatpush3.bf16.msra.mxu0 %v2563_v4  ;;  %v2541_v44 = vmax.f32 %v2521_v18, 0.0  ;;  %v2636_v63 = vpop.permute.xlu0 %2635 }
 0x3f7   : > { %v2516_v42 = vadd.f32 %v2515_v35, %v2353_v2  ;;  %3932 = vmatprep.subr.bf16.mxu0 %v2564_v1  ;;  %v2539_v58 = vmax.f32 %v2513_v40, 0.0 }
 0x3f8   : > { %v2542_v50 = vmax.f32 %v2524_v34, 0.0 }
 0x3f9   : > { %v2540_v59 = vmax.f32 %v2516_v42, 0.0  ;;  %v2631_v25 = vpop.permute.xlu1 %2630 }
 0x3fa   : > { %v2566_v3 = vpack.c.bf16 %v2542_v50, %v2541_v44  ;;  %3933 = vmatpush3.bf16.msra.mxu0 %v2564_v1  ;;  %v2646_v1 = vpop.permute.xlu0 %2645 }
 0x3fb   : > { %v2565_v12 = vpack.c.bf16 %v2540_v59, %v2539_v58 }
 0x3fd   : > { %3934 = vmatprep.subr.bf16.mxu0 %v2565_v12  ;;  %v2641_v6 = vpop.permute.xlu1 %2640 }
 0x3fe   : > { %3935 = vmatpush3.bf16.msra.mxu0 %v2565_v12  ;;  %v2656_v42 = vpop.permute.xlu0 %2655 }
 0x3ff   : > { %3936 = vmatprep.subr.bf16.mxu0 %v2566_v3 }
 0x401   : > { %v2651_v47 = vpop.permute.xlu1 %2650 }
 0x402   : > { %3937 = vmatpush3.bf16.msra.mxu0 %v2566_v3 }
 0x405   : > { %3939 = vmatmul.mubr.bf16.vlgmr.msra.gmra.mrb[64].mxu0 %v4045_v5  ;;  %v2661_v59 = vpop.permute.xlu1 %2660 }
 0x406   : > { %3942 = vmatprep.mubr.bf16.mxu0 %v4046_v56 }
 0x40d   : > { %3943 = vmatmul.mubr.bf16.gmra.mrb[68].mxu0 %v4047_v62 }
 0x40e   : > { %3946 = vmatprep.mubr.bf16.mxu0 %v4048_v14 }
 0x415   : > { %3947 = vmatmul.mubr.bf16.gmra.mrb[72].mxu0 %v4049_v57 }
 0x416   : > { %3950 = vmatprep.mubr.bf16.mxu0 %v4050_v22 }
 0x41d   : > { %3951 = vmatmul.mubr.bf16.gmra.mrb[76].mxu0 %v4051_v23 }
 0x4d8   : > { %v3940_v51 = vpop.f32.mrb[64].mxu0 }
 0x4d9   : > { %v2754_v33 = vadd.f32 %v3940_v51, %v2596_v61  ;;  %v2745_v36 = vpop.f32.mrb[65].mxu0 }
 0x4da   : > { %v2746_v38 = vadd.f32 %v2745_v36, %v2586_v24  ;;  %v3941_v39 = vpop.f32.mrb[66].mxu0 }
 0x4db   : > { %v2810_v41 = vmax.f32 %v2754_v33, 0.0  ;;  %v2757_v10 = vadd.f32 %v3941_v39, %v2601_v43  ;;  %v2748_v46 = vpop.f32.mrb[67].mxu0 }
 0x4dc   : > { %v2808_v16 = vmax.f32 %v2746_v38, 0.0  ;;  %v2749_v17 = vadd.f32 %v2748_v46, %v2591_v28 }
 0x4dd   : > { %2826 = vst [vmem:[%s5363_s23 + $0x10] sm:$0xff] %v2810_v41  ;;  %v2811_v20 = vmax.f32 %v2757_v10, 0.0 }
 0x4de   : > { %2824 = vst [vmem:[%s5363_s23] sm:$0xff] %v2808_v16  ;;  %v2809_v21 = vmax.f32 %v2749_v17, 0.0 }
 0x4df   : > { %2827 = vst [vmem:[%s5363_s23 + $0x18] sm:$0xff] %v2811_v20 }
 0x4e0   : > { %2825 = vst [vmem:[%s5363_s23 + $0x8] sm:$0xff] %v2809_v21  ;;  %v3944_v48 = vpop.f32.mrb[68].mxu0 }
 0x4e1   : > { %v2770_v49 = vadd.f32 %v3944_v48, %v2616_v32  ;;  %v2761_v52 = vpop.f32.mrb[69].mxu0 }
 0x4e2   : > { %v2762_v53 = vadd.f32 %v2761_v52, %v2606_v30  ;;  %v3945_v29 = vpop.f32.mrb[70].mxu0 }
 0x4e3   : > { %v2814_v54 = vmax.f32 %v2770_v49, 0.0  ;;  %v2773_v55 = vadd.f32 %v3945_v29, %v2621_v37  ;;  %v2764_v60 = vpop.f32.mrb[71].mxu0 }
 0x4e4   : > { %v2812_v9 = vmax.f32 %v2762_v53, 0.0  ;;  %v2765_v0 = vadd.f32 %v2764_v60, %v2611_v31 }
 0x4e5   : > { %2830 = vst [vmem:[%s5363_s23 + $0x30] sm:$0xff] %v2814_v54  ;;  %v2815_v2 = vmax.f32 %v2773_v55, 0.0 }
 0x4e6   : > { %2828 = vst [vmem:[%s5363_s23 + $0x20] sm:$0xff] %v2812_v9  ;;  %v2813_v7 = vmax.f32 %v2765_v0, 0.0 }
 0x4e7   : > { %2831 = vst [vmem:[%s5363_s23 + $0x38] sm:$0xff] %v2815_v2 }
 0x4e8   : > { %2829 = vst [vmem:[%s5363_s23 + $0x28] sm:$0xff] %v2813_v7  ;;  %v3948_v15 = vpop.f32.mrb[72].mxu0 }
 0x4e9   : > { %v2786_v11 = vadd.f32 %v3948_v15, %v2636_v63  ;;  %v2777_v13 = vpop.f32.mrb[73].mxu0 }
 0x4ea   : > { %v2778_v45 = vadd.f32 %v2777_v13, %v2626_v19  ;;  %v3949_v4 = vpop.f32.mrb[74].mxu0 }
 0x4eb   : > { %v2818_v8 = vmax.f32 %v2786_v11, 0.0  ;;  %v2789_v18 = vadd.f32 %v3949_v4, %v2641_v6  ;;  %v2780_v26 = vpop.f32.mrb[75].mxu0 }
 0x4ec   : > { %v2816_v40 = vmax.f32 %v2778_v45, 0.0  ;;  %v2781_v27 = vadd.f32 %v2780_v26, %v2631_v25 }
 0x4ed   : > { %2834 = vst [vmem:[%s5363_s23 + $0x50] sm:$0xff] %v2818_v8  ;;  %v2819_v34 = vmax.f32 %v2789_v18, 0.0 }
 0x4ee   : > { %2832 = vst [vmem:[%s5363_s23 + $0x40] sm:$0xff] %v2816_v40  ;;  %v2817_v35 = vmax.f32 %v2781_v27, 0.0 }
 0x4ef   : > { %2835 = vst [vmem:[%s5363_s23 + $0x58] sm:$0xff] %v2819_v34 }
 0x4f0   : > { %2833 = vst [vmem:[%s5363_s23 + $0x48] sm:$0xff] %v2817_v35  ;;  %v3952_v44 = vpop.f32.mrb[76].mxu0 }
 0x4f1   : > { %v2802_v50 = vadd.f32 %v3952_v44, %v2656_v42  ;;  %v2793_v58 = vpop.f32.mrb[77].mxu0 }
 0x4f2   : > { %v2794_v3 = vadd.f32 %v2793_v58, %v2646_v1  ;;  %v3953_v12 = vpop.f32.mrb[78].mxu0 }
 0x4f3   : > { %v2822_v5 = vmax.f32 %v2802_v50, 0.0  ;;  %v2805_v56 = vadd.f32 %v3953_v12, %v2661_v59  ;;  %v2796_v62 = vpop.f32.mrb[79].mxu0 }
 0x4f4   : > { %v2820_v14 = vmax.f32 %v2794_v3, 0.0  ;;  %v2797_v57 = vadd.f32 %v2796_v62, %v2651_v47 }
 0x4f5   : > { %2838 = vst [vmem:[%s5363_s23 + $0x70] sm:$0xff] %v2822_v5  ;;  %v2823_v22 = vmax.f32 %v2805_v56, 0.0 }
 0x4f6   : > { %2836 = vst [vmem:[%s5363_s23 + $0x60] sm:$0xff] %v2820_v14  ;;  %v2821_v23 = vmax.f32 %v2797_v57, 0.0 }
 0x4f7   : > { %2839 = vst [vmem:[%s5363_s23 + $0x78] sm:$0xff] %v2823_v22 }
 0x4f8   : > { %2837 = vst [vmem:[%s5363_s23 + $0x68] sm:$0xff] %v2821_v23 }
 0x4f9   : > { %4065 = shalt.err (!%p4062_p9)
}
 0x4fa   : > { %s4066_s20 = scalar_lea.hbm %s5383_s9, 2048  ;;  %s4070_s27 = scalar_lea.hbm %s5452_s7, 8192 }
 0x4fb   : > { %p4067_p10 = scmp.ne.s32.totalorder %s5383_s9, %s4066_s20  ;;  %p4071_p13 = scmp.lt.u32.totalorder %s5383_s9, %s5452_s7 }
 0x4fc   : > { %p4072_p0 = scmp.lt.u32.totalorder %s4070_s27, %s4066_s20  ;;  %p4074_p2 = scmp.lt.u32.totalorder %s4066_s20, %s5383_s9 }
 0x4fd   : > { %p4068_p11 = pnand %p4067_p10, %p4245_p3 }
 0x4fe   : > { %p4073_p1 = por %p4072_p0, %p4071_p13 }
 0x4ff   : > { %p4069_p12 = pneg %p4068_p11 }
 0x500   : > { %p4075_p4 = por %p4074_p2, %p4073_p1 }
 0x502   : > { %p4076_p5 = pnand %p4075_p4, %p4069_p12 }
 0x504   : > { %4079 = shalt.err (!%p4076_p5)
}
 0x505   : > { %s4151_s13 = smov 128   ;;  %s4152_s16 = smov 256  }
 0x506   : > { %s4153_s17 = smov 8  }
 0x507   : > { %3954 = dma.vmem_to_hbm [thread:$0]  (%p4245_p3), %s5386_s28, 2048, %s5383_s9, %s5393_s10, %s4151_s13, %s4152_s16, %s4153_s17  }
 0x508 PF: > { %p3960_p6 = scmp.ge.s32.totalorder %s4146_s8, 2  ;;  %s2870_s23 = sand.u32 1, %s4118_s24  }
 0x509   : > { %s2871_s20 = scalar_lea.sflag [#allocation3], %s2870_s23 }
 0x50a   : > { %p3957_p7 = pnand %p3960_p6, %p4254_p8 }
 0x50c   : > { %4113 = dma.done.wait (!%p3957_p7), %s2871_s20, 2048  }
 0x50d   : > { %4115 = vsyncadd (!%p3957_p7), %s2871_s20, 4294965248  ;;  %s20_s8 = sadd.s32 1, %s4146_s8   ;;  %s5480_s24 = smov %s4122_s25 }
 0x50e   : > { %p17_p9 = scmp.ge.s32.totalorder %s20_s8, 6   ;;  %s5481_s25 = smov %s4126_s26 }
 0x50f   : > { %s5482_s26 = smov %s4263_s19  ;;  %s5483_s27 = smov %s4138_s29 }
 0x510   : > { %s5484_s28 = smov %s4142_s30  ;;  %s5485_s29 = smov %s5488_s11 }
 0x511   : > { %s5486_s30 = smov %s5492_s12  ;;  %19 = sbr.rel (!%p17_p9) target bundleno = 5 (0x5), region = 101 }
 0x518   :  { %2876 = vsyncpa [#allocation3], 1 }
 0x519   :  { %2878 = vsyncpa [#allocation3 + $0x1], 1 }

</bundles_post_ra>
